<compile_context>
chip_gen: v7x
topology: tpu7x:2x2x1
jax: 0.10.0
libtpu: 0.0.40
codegen_flags: <defaults>
</compile_context>

<pallas_src>
import jax
import jax.numpy as jnp
from jax.experimental import pallas as pl
from jax.experimental.pallas import tpu as pltpu


# Whole-array, VMEM-resident operand (no grid -> single kernel invocation).
_VMEM = pl.BlockSpec(memory_space=pltpu.MemorySpace.VMEM)


# --------------------------- kernels ---------------------------

def rdm_gru_kernel(x_ref, wi_ref, wh_ref, bi_ref, bhn_ref, out_ref):
    """Full-sequence single-layer GRU, zero initial state (PyTorch gate order r|z|n).

    x_ref:   (B, S, E)  batch-first input (natural layout, no wrapper transpose)
    wi_ref:  (E, 3H)    [W_ir | W_iz | W_in]^T   (fused input-gate weights)
    wh_ref:  (H, 3H)    [W_hr | W_hz | W_hn]^T   (fused hidden-gate weights)
    bi_ref:  (1, 3H)    [b_ir+b_hr | b_iz+b_hz | b_in]
    bhn_ref: (1, H)     b_hn (added before the r * (...) product)
    out_ref: (B, S, H)  per-step hidden states, already in the consumer layout
    """
    B, S, H = out_ref.shape
    E = x_ref.shape[-1]

    # Hoisted input-side gate projection for the whole sequence: ONE MXU matmul.
    # (B,S,E)->(B*S,E) and (B*S,3H)->(B,S,3H) are layout-preserving leading-dim
    # collapses/expands (S maps to the sublane dim), so no data movement.
    x2d = x_ref[...].reshape(B * S, E)
    gi_all = (jnp.dot(x2d, wi_ref[...], preferred_element_type=jnp.float32)
              + bi_ref[...]).reshape(B, S, 3 * H)                     # (B, S, 3H)

    wh = wh_ref[...]                                                  # (H, 3H), read once
    bhn = bhn_ref[...]                                                # (1, H)
    h = jnp.zeros((B, H), jnp.float32)                                # RDM zero init state

    # S is small and static -> full unroll with static indices.
    # For large S switch to lax.fori_loop(..., unroll=k) to bound live ranges.
    for t in range(S):
        gi = gi_all[:, t, :]                                          # (B, 3H), static index
        gh = jnp.dot(h, wh, preferred_element_type=jnp.float32)       # (B, 3H), one matmul/step
        r = jax.nn.sigmoid(gi[:, :H] + gh[:, :H])
        z = jax.nn.sigmoid(gi[:, H:2 * H] + gh[:, H:2 * H])
        n = jnp.tanh(gi[:, 2 * H:] + r * (gh[:, 2 * H:] + bhn))
        h = (1.0 - z) * n + z * h
        # Store into the resident VMEM output block (single bulk HBM writeback
        # after the kernel); negligible at S=8/H=32.
        out_ref[:, t, :] = h


def cm_step_kernel(x_ref, state_ref, wi_ref, wh_ref, bi_ref, bhn_ref,
                   wd_ref, bd_ref, wc_ref, bc_ref,
                   score_ref, state_out_ref):
    """Fused CM_Model.forward for T == 1:
       one GRU step + DenseLayer + ReLU + Classifier, in a single pallas_call.

    x_ref:       (B, 1, E)   rl_input
    state_ref:   (1, B, H)   rl_state  (indexed in-kernel, no wrapper slice)
    wi/wh/bi/bhn: fused GRU weights as in rdm_gru_kernel
    wd_ref:      (H, 64), bd_ref: (1, 64)   DenseLayer
    wc_ref:      (64, A), bc_ref: (1, A)    Classifier
    score_ref:     (B, A)    stopScore
    state_out_ref: (1, B, H) rl_new_state
    """
    H = wh_ref.shape[0]

    x = x_ref[:, 0, :]                                                # (B, E)  (T == 1)
    h = state_ref[0]                                                  # (B, H)

    gi = jnp.dot(x, wi_ref[...], preferred_element_type=jnp.float32) + bi_ref[...]
    gh = jnp.dot(h, wh_ref[...], preferred_element_type=jnp.float32)
    r = jax.nn.sigmoid(gi[:, :H] + gh[:, :H])
    z = jax.nn.sigmoid(gi[:, H:2 * H] + gh[:, H:2 * H])
    n = jnp.tanh(gi[:, 2 * H:] + r * (gh[:, 2 * H:] + bhn_ref[...]))
    h_new = (1.0 - z) * n + z * h                                     # (B, H)

    state_out_ref[0] = h_new                                          # rl_new_state

    h1 = jnp.maximum(
        jnp.dot(h_new, wd_ref[...], preferred_element_type=jnp.float32) + bd_ref[...],
        0.0)
    score_ref[...] = (jnp.dot(h1, wc_ref[...], preferred_element_type=jnp.float32)
                      + bc_ref[...])


# ------------------ one-time parameter layout prep (outside jit) ------------------

def make_gru_params(w_ih, w_hh, b_ih, b_hh):
    """PyTorch GRU params -> kernel layout.  Done once at model setup, not per call."""
    H = w_hh.shape[1]
    return {
        "wi": jnp.asarray(w_ih).T,                                    # (E, 3H)
        "wh": jnp.asarray(w_hh).T,                                    # (H, 3H)
        "bi": jnp.concatenate([b_ih[:2 * H] + b_hh[:2 * H],
                               b_ih[2 * H:]]).reshape(1, 3 * H),      # (1, 3H)
        "bhn": jnp.asarray(b_hh[2 * H:]).reshape(1, H),               # (1, H)
    }


def make_cm_head_params(dense_w, dense_b, clf_w, clf_b):
    """PyTorch Linear params -> kernel layout.  Done once at model setup."""
    return {
        "wd": jnp.asarray(dense_w).T,                                 # (H, 64)
        "bd": jnp.asarray(dense_b).reshape(1, -1),                    # (1, 64)
        "wc": jnp.asarray(clf_w).T,                                   # (64, A)
        "bc": jnp.asarray(clf_b).reshape(1, -1),                      # (1, A)
    }


# --------------------------- forward wrappers ---------------------------

@jax.jit
def rdm_forward(x_emb, gru_params):
    """RDM_Model.forward: x_emb [B, S, 1, E] -> df_outputs [B, S, H]."""
    B, S, _, E = x_emb.shape
    H = gru_params["wh"].shape[0]
    # Matches the PyTorch reshape([-1, max_seq_len, emb_dim]); metadata-only.
    x = x_emb.reshape(B, S, E)
    return pl.pallas_call(
        rdm_gru_kernel,
        out_shape=jax.ShapeDtypeStruct((B, S, H), jnp.float32),
        in_specs=[_VMEM] * 5,
        out_specs=_VMEM,
    )(x, gru_params["wi"], gru_params["wh"], gru_params["bi"], gru_params["bhn"])


@jax.jit
def cm_forward(gru_params, head_params, rl_input, rl_state):
    """CM_Model.forward: returns (stopScore [B, A], isStop [B], rl_new_state [1, B, H])."""
    B, T, _ = rl_input.shape
    # PyTorch does rl_output.reshape([B, hidden_dim]) -> only valid for T == 1.
    assert T == 1, "CM_Model.forward requires max_word_num == 1 (as in the PyTorch code)"
    H = gru_params["wh"].shape[0]
    A = head_params["wc"].shape[1]

    stop_score, new_state = pl.pallas_call(
        cm_step_kernel,
        out_shape=(jax.ShapeDtypeStruct((B, A), jnp.float32),
                   jax.ShapeDtypeStruct((1, B, H), jnp.float32)),
        in_specs=[_VMEM] * 10,
        out_specs=(_VMEM, _VMEM),
    )(rl_input, rl_state,
      gru_params["wi"], gru_params["wh"], gru_params["bi"], gru_params["bhn"],
      head_params["wd"], head_params["bd"], head_params["wc"], head_params["bc"])

    # argmax over the tiny (B, A) score matrix stays in the wrapper (per review).
    is_stop = jnp.argmax(stop_score, axis=1)
    return stop_score, is_stop, new_state


# ----------------------------- pure-JAX references -----------------------------

def gru_reference(x, w_ih, w_hh, b_ih, b_hh, h0):
    """PyTorch-semantics GRU reference. x: [B, S, E], h0: [B, H] -> [B, S, H]."""
    H = w_hh.shape[1]

    def step(h, x_t):
        gi = x_t @ w_ih.T + b_ih
        gh = h @ w_hh.T + b_hh
        r = jax.nn.sigmoid(gi[:, :H] + gh[:, :H])
        z = jax.nn.sigmoid(gi[:, H:2 * H] + gh[:, H:2 * H])
        n = jnp.tanh(gi[:, 2 * H:] + r * gh[:, 2 * H:])
        h_new = (1.0 - z) * n + z * h
        return h_new, h_new

    _, ys = jax.lax.scan(step, h0, x.transpose(1, 0, 2))
    return ys.transpose(1, 0, 2)


def cm_reference(w_ih, w_hh, b_ih, b_hh, dense_w, dense_b, clf_w, clf_b,
                 rl_input, rl_state):
    B, T, _ = rl_input.shape
    H = w_hh.shape[1]
    out = gru_reference(rl_input, w_ih, w_hh, b_ih, b_hh, rl_state[0])
    new_state = out[:, -1, :][None]
    h1 = jax.nn.relu(out.reshape(B, H) @ dense_w.T + dense_b)
    score = h1 @ clf_w.T + clf_b
    return score, jnp.argmax(score, axis=1), new_state


if __name__ == "__main__":
    # Small shapes consistent with the module's forward:
    #   RDM path: x_emb [B, S, 1, E]; CM path: rl_input [B, 1, E], rl_state [1, B, H]
    B, S, E, H, DENSE, A = 2, 8, 32, 32, 64, 2

    key = jax.random.PRNGKey(0)
    keys = jax.random.split(key, 10)

    bound = 1.0 / jnp.sqrt(jnp.float32(H))
    w_ih = jax.random.uniform(keys[0], (3 * H, E), jnp.float32, -bound, bound)
    w_hh = jax.random.uniform(keys[1], (3 * H, H), jnp.float32, -bound, bound)
    b_ih = jax.random.uniform(keys[2], (3 * H,), jnp.float32, -bound, bound)
    b_hh = jax.random.uniform(keys[3], (3 * H,), jnp.float32, -bound, bound)
    dense_w = jax.random.uniform(keys[4], (DENSE, H), jnp.float32, -bound, bound)
    dense_b = jax.random.uniform(keys[5], (DENSE,), jnp.float32, -bound, bound)
    clf_w = jax.random.uniform(keys[6], (A, DENSE), jnp.float32, -0.125, 0.125)
    clf_b = jax.random.uniform(keys[7], (A,), jnp.float32, -0.125, 0.125)

    x_emb = jax.random.normal(keys[8], (B, S, 1, E), dtype=jnp.float32)
    rl_input = jax.random.normal(keys[9], (B, 1, E), dtype=jnp.float32)

    # One-time layout prep (equivalent to storing the parameters in kernel layout).
    gru_params = make_gru_params(w_ih, w_hh, b_ih, b_hh)
    head_params = make_cm_head_params(dense_w, dense_b, clf_w, clf_b)

    # --- RDM_Model.forward: full sequence, zero initial state ---
    df_outputs = jax.block_until_ready(rdm_forward(x_emb, gru_params))
    df_ref = gru_reference(x_emb.reshape(B, S, E), w_ih, w_hh, b_ih, b_hh,
                           jnp.zeros((B, H), jnp.float32))
    assert df_outputs.shape == (B, S, H), df_outputs.shape
    assert jnp.allclose(df_outputs, df_ref, atol=1e-4, rtol=1e-4), "GRU mismatch"

    # --- CM_Model.forward: one fused call (GRU step + Dense/ReLU + Classifier) ---
    rl_state = df_outputs[:, -1, :][None]          # [1, B, H]
    score, is_stop, new_state = cm_forward(gru_params, head_params, rl_input, rl_state)
    score = jax.block_until_ready(score)
    score_ref, is_stop_ref, new_state_ref = cm_reference(
        w_ih, w_hh, b_ih, b_hh, dense_w, dense_b, clf_w, clf_b, rl_input, rl_state)
    assert score.shape == (B, A) and is_stop.shape == (B,)
    assert new_state.shape == (1, B, H)
    assert jnp.allclose(score, score_ref, atol=1e-4, rtol=1e-4), "head mismatch"
    assert jnp.allclose(new_state, new_state_ref, atol=1e-4, rtol=1e-4), "state mismatch"
    assert jnp.array_equal(is_stop, is_stop_ref), "argmax mismatch"

    print("KERNEL_OK")
</pallas_src>

<mosaic_0001>
module attributes {stable_mosaic.version = 11 : i64} {
  func.func @rdm_gru_kernel(%arg0: memref<2x8x32xf32, #tpu.memory_space<vmem>>, %arg1: memref<32x96xf32, #tpu.memory_space<vmem>>, %arg2: memref<32x96xf32, #tpu.memory_space<vmem>>, %arg3: memref<1x96xf32, #tpu.memory_space<vmem>>, %arg4: memref<1x32xf32, #tpu.memory_space<vmem>>, %arg5: memref<2x8x32xf32, #tpu.memory_space<vmem>>) attributes {dimension_semantics = [], scalar_prefetch = 0 : i64, scratch_operands = 0 : i64, tpu.core_type = #tpu.core_type<tc>} {
    %c0 = arith.constant 0 : index
    %c0_0 = arith.constant 0 : index
    %c0_1 = arith.constant 0 : index
    %0 = vector.load %arg0[%c0, %c0_0, %c0_1] : memref<2x8x32xf32, #tpu.memory_space<vmem>>, vector<2x8x32xf32>
    %1 = vector.shape_cast %0 : vector<2x8x32xf32> to vector<16x32xf32>
    %c0_2 = arith.constant 0 : index
    %c0_3 = arith.constant 0 : index
    %2 = vector.load %arg1[%c0_2, %c0_3] : memref<32x96xf32, #tpu.memory_space<vmem>>, vector<32x96xf32>
    %cst = arith.constant dense<0.000000e+00> : vector<16x96xf32>
    %3 = tpu.matmul %1, %2, %cst {dimension_numbers = #tpu.dot_dimension_numbers<[1], [0], [0], [1], [0, 0, 1, 1], [], []>} : vector<16x32xf32>, vector<32x96xf32>, vector<16x96xf32> -> vector<16x96xf32>
    %c0_4 = arith.constant 0 : index
    %c0_5 = arith.constant 0 : index
    %4 = vector.load %arg3[%c0_4, %c0_5] : memref<1x96xf32, #tpu.memory_space<vmem>>, vector<1x96xf32>
    %5 = vector.broadcast %4 : vector<1x96xf32> to vector<16x96xf32>
    %6 = arith.addf %3, %5 : vector<16x96xf32>
    %7 = vector.shape_cast %6 : vector<16x96xf32> to vector<2x8x96xf32>
    %c0_6 = arith.constant 0 : index
    %c0_7 = arith.constant 0 : index
    %8 = vector.load %arg2[%c0_6, %c0_7] : memref<32x96xf32, #tpu.memory_space<vmem>>, vector<32x96xf32>
    %c0_8 = arith.constant 0 : index
    %c0_9 = arith.constant 0 : index
    %9 = vector.load %arg4[%c0_8, %c0_9] : memref<1x32xf32, #tpu.memory_space<vmem>>, vector<1x32xf32>
    %cst_10 = arith.constant 0.000000e+00 : f32
    %10 = vector.broadcast %cst_10 : f32 to vector<2x32xf32>
    %11 = vector.extract_strided_slice %7 {offsets = [0, 0, 0], sizes = [2, 1, 96], strides = [1, 1, 1]} : vector<2x8x96xf32> to vector<2x1x96xf32>
    %12 = vector.shape_cast %11 : vector<2x1x96xf32> to vector<2x96xf32>
    %cst_11 = arith.constant dense<0.000000e+00> : vector<2x96xf32>
    %13 = tpu.matmul %10, %8, %cst_11 {dimension_numbers = #tpu.dot_dimension_numbers<[1], [0], [0], [1], [0, 0, 1, 1], [], []>} : vector<2x32xf32>, vector<32x96xf32>, vector<2x96xf32> -> vector<2x96xf32>
    %14 = vector.extract_strided_slice %12 {offsets = [0, 0], sizes = [2, 32], strides = [1, 1]} : vector<2x96xf32> to vector<2x32xf32>
    %15 = vector.extract_strided_slice %13 {offsets = [0, 0], sizes = [2, 32], strides = [1, 1]} : vector<2x96xf32> to vector<2x32xf32>
    %16 = arith.addf %14, %15 : vector<2x32xf32>
    %17 = arith.negf %16 : vector<2x32xf32>
    %18 = math.exp %17 : vector<2x32xf32>
    %cst_12 = arith.constant 1.000000e+00 : f32
    %19 = vector.broadcast %cst_12 : f32 to vector<2x32xf32>
    %20 = arith.addf %19, %18 : vector<2x32xf32>
    %21 = arith.divf %19, %20 : vector<2x32xf32>
    %22 = vector.extract_strided_slice %12 {offsets = [0, 32], sizes = [2, 32], strides = [1, 1]} : vector<2x96xf32> to vector<2x32xf32>
    %23 = vector.extract_strided_slice %13 {offsets = [0, 32], sizes = [2, 32], strides = [1, 1]} : vector<2x96xf32> to vector<2x32xf32>
    %24 = arith.addf %22, %23 : vector<2x32xf32>
    %25 = arith.negf %24 : vector<2x32xf32>
    %26 = math.exp %25 : vector<2x32xf32>
    %cst_13 = arith.constant 1.000000e+00 : f32
    %27 = vector.broadcast %cst_13 : f32 to vector<2x32xf32>
    %28 = arith.addf %27, %26 : vector<2x32xf32>
    %29 = arith.divf %27, %28 : vector<2x32xf32>
    %30 = vector.extract_strided_slice %12 {offsets = [0, 64], sizes = [2, 32], strides = [1, 1]} : vector<2x96xf32> to vector<2x32xf32>
    %31 = vector.extract_strided_slice %13 {offsets = [0, 64], sizes = [2, 32], strides = [1, 1]} : vector<2x96xf32> to vector<2x32xf32>
    %32 = vector.broadcast %9 : vector<1x32xf32> to vector<2x32xf32>
    %33 = arith.addf %31, %32 : vector<2x32xf32>
    %34 = arith.mulf %21, %33 : vector<2x32xf32>
    %35 = arith.addf %30, %34 : vector<2x32xf32>
    %36 = math.tanh %35 : vector<2x32xf32>
    %cst_14 = arith.constant 1.000000e+00 : f32
    %37 = vector.broadcast %cst_14 : f32 to vector<2x32xf32>
    %38 = arith.subf %37, %29 : vector<2x32xf32>
    %39 = arith.mulf %38, %36 : vector<2x32xf32>
    %40 = arith.mulf %29, %10 : vector<2x32xf32>
    %41 = arith.addf %39, %40 : vector<2x32xf32>
    %c0_15 = arith.constant 0 : index
    %c0_16 = arith.constant 0 : index
    %c0_17 = arith.constant 0 : index
    %42 = vector.load %arg5[%c0_15, %c0_16, %c0_17] : memref<2x8x32xf32, #tpu.memory_space<vmem>>, vector<2x1x32xf32>
    %43 = vector.shape_cast %42 : vector<2x1x32xf32> to vector<2x32xf32>
    %44 = vector.shape_cast %41 : vector<2x32xf32> to vector<2x1x32xf32>
    tpu.vector_store %arg5[%c0_15, %c0_16, %c0_17], %44 {strides = array<i32>} : memref<2x8x32xf32, #tpu.memory_space<vmem>>, vector<2x1x32xf32>,
    %45 = vector.extract_strided_slice %7 {offsets = [0, 1, 0], sizes = [2, 1, 96], strides = [1, 1, 1]} : vector<2x8x96xf32> to vector<2x1x96xf32>
    %46 = vector.shape_cast %45 : vector<2x1x96xf32> to vector<2x96xf32>
    %cst_18 = arith.constant dense<0.000000e+00> : vector<2x96xf32>
    %47 = tpu.matmul %41, %8, %cst_18 {dimension_numbers = #tpu.dot_dimension_numbers<[1], [0], [0], [1], [0, 0, 1, 1], [], []>} : vector<2x32xf32>, vector<32x96xf32>, vector<2x96xf32> -> vector<2x96xf32>
    %48 = vector.extract_strided_slice %46 {offsets = [0, 0], sizes = [2, 32], strides = [1, 1]} : vector<2x96xf32> to vector<2x32xf32>
    %49 = vector.extract_strided_slice %47 {offsets = [0, 0], sizes = [2, 32], strides = [1, 1]} : vector<2x96xf32> to vector<2x32xf32>
    %50 = arith.addf %48, %49 : vector<2x32xf32>
    %51 = arith.negf %50 : vector<2x32xf32>
    %52 = math.exp %51 : vector<2x32xf32>
    %cst_19 = arith.constant 1.000000e+00 : f32
    %53 = vector.broadcast %cst_19 : f32 to vector<2x32xf32>
    %54 = arith.addf %53, %52 : vector<2x32xf32>
    %55 = arith.divf %53, %54 : vector<2x32xf32>
    %56 = vector.extract_strided_slice %46 {offsets = [0, 32], sizes = [2, 32], strides = [1, 1]} : vector<2x96xf32> to vector<2x32xf32>
    %57 = vector.extract_strided_slice %47 {offsets = [0, 32], sizes = [2, 32], strides = [1, 1]} : vector<2x96xf32> to vector<2x32xf32>
    %58 = arith.addf %56, %57 : vector<2x32xf32>
    %59 = arith.negf %58 : vector<2x32xf32>
    %60 = math.exp %59 : vector<2x32xf32>
    %cst_20 = arith.constant 1.000000e+00 : f32
    %61 = vector.broadcast %cst_20 : f32 to vector<2x32xf32>
    %62 = arith.addf %61, %60 : vector<2x32xf32>
    %63 = arith.divf %61, %62 : vector<2x32xf32>
    %64 = vector.extract_strided_slice %46 {offsets = [0, 64], sizes = [2, 32], strides = [1, 1]} : vector<2x96xf32> to vector<2x32xf32>
    %65 = vector.extract_strided_slice %47 {offsets = [0, 64], sizes = [2, 32], strides = [1, 1]} : vector<2x96xf32> to vector<2x32xf32>
    %66 = vector.broadcast %9 : vector<1x32xf32> to vector<2x32xf32>
    %67 = arith.addf %65, %66 : vector<2x32xf32>
    %68 = arith.mulf %55, %67 : vector<2x32xf32>
    %69 = arith.addf %64, %68 : vector<2x32xf32>
    %70 = math.tanh %69 : vector<2x32xf32>
    %cst_21 = arith.constant 1.000000e+00 : f32
    %71 = vector.broadcast %cst_21 : f32 to vector<2x32xf32>
    %72 = arith.subf %71, %63 : vector<2x32xf32>
    %73 = arith.mulf %72, %70 : vector<2x32xf32>
    %74 = arith.mulf %63, %41 : vector<2x32xf32>
    %75 = arith.addf %73, %74 : vector<2x32xf32>
    %c0_22 = arith.constant 0 : index
    %c1 = arith.constant 1 : index
    %c0_23 = arith.constant 0 : index
    %76 = vector.load %arg5[%c0_22, %c1, %c0_23] : memref<2x8x32xf32, #tpu.memory_space<vmem>>, vector<2x1x32xf32>
    %77 = vector.shape_cast %76 : vector<2x1x32xf32> to vector<2x32xf32>
    %78 = vector.shape_cast %75 : vector<2x32xf32> to vector<2x1x32xf32>
    tpu.vector_store %arg5[%c0_22, %c1, %c0_23], %78 {strides = array<i32>} : memref<2x8x32xf32, #tpu.memory_space<vmem>>, vector<2x1x32xf32>,
    %79 = vector.extract_strided_slice %7 {offsets = [0, 2, 0], sizes = [2, 1, 96], strides = [1, 1, 1]} : vector<2x8x96xf32> to vector<2x1x96xf32>
    %80 = vector.shape_cast %79 : vector<2x1x96xf32> to vector<2x96xf32>
    %cst_24 = arith.constant dense<0.000000e+00> : vector<2x96xf32>
    %81 = tpu.matmul %75, %8, %cst_24 {dimension_numbers = #tpu.dot_dimension_numbers<[1], [0], [0], [1], [0, 0, 1, 1], [], []>} : vector<2x32xf32>, vector<32x96xf32>, vector<2x96xf32> -> vector<2x96xf32>
    %82 = vector.extract_strided_slice %80 {offsets = [0, 0], sizes = [2, 32], strides = [1, 1]} : vector<2x96xf32> to vector<2x32xf32>
    %83 = vector.extract_strided_slice %81 {offsets = [0, 0], sizes = [2, 32], strides = [1, 1]} : vector<2x96xf32> to vector<2x32xf32>
    %84 = arith.addf %82, %83 : vector<2x32xf32>
    %85 = arith.negf %84 : vector<2x32xf32>
    %86 = math.exp %85 : vector<2x32xf32>
    %cst_25 = arith.constant 1.000000e+00 : f32
    %87 = vector.broadcast %cst_25 : f32 to vector<2x32xf32>
    %88 = arith.addf %87, %86 : vector<2x32xf32>
    %89 = arith.divf %87, %88 : vector<2x32xf32>
    %90 = vector.extract_strided_slice %80 {offsets = [0, 32], sizes = [2, 32], strides = [1, 1]} : vector<2x96xf32> to vector<2x32xf32>
    %91 = vector.extract_strided_slice %81 {offsets = [0, 32], sizes = [2, 32], strides = [1, 1]} : vector<2x96xf32> to vector<2x32xf32>
    %92 = arith.addf %90, %91 : vector<2x32xf32>
    %93 = arith.negf %92 : vector<2x32xf32>
    %94 = math.exp %93 : vector<2x32xf32>
    %cst_26 = arith.constant 1.000000e+00 : f32
    %95 = vector.broadcast %cst_26 : f32 to vector<2x32xf32>
    %96 = arith.addf %95, %94 : vector<2x32xf32>
    %97 = arith.divf %95, %96 : vector<2x32xf32>
    %98 = vector.extract_strided_slice %80 {offsets = [0, 64], sizes = [2, 32], strides = [1, 1]} : vector<2x96xf32> to vector<2x32xf32>
    %99 = vector.extract_strided_slice %81 {offsets = [0, 64], sizes = [2, 32], strides = [1, 1]} : vector<2x96xf32> to vector<2x32xf32>
    %100 = vector.broadcast %9 : vector<1x32xf32> to vector<2x32xf32>
    %101 = arith.addf %99, %100 : vector<2x32xf32>
    %102 = arith.mulf %89, %101 : vector<2x32xf32>
    %103 = arith.addf %98, %102 : vector<2x32xf32>
    %104 = math.tanh %103 : vector<2x32xf32>
    %cst_27 = arith.constant 1.000000e+00 : f32
    %105 = vector.broadcast %cst_27 : f32 to vector<2x32xf32>
    %106 = arith.subf %105, %97 : vector<2x32xf32>
    %107 = arith.mulf %106, %104 : vector<2x32xf32>
    %108 = arith.mulf %97, %75 : vector<2x32xf32>
    %109 = arith.addf %107, %108 : vector<2x32xf32>
    %c0_28 = arith.constant 0 : index
    %c2 = arith.constant 2 : index
    %c0_29 = arith.constant 0 : index
    %110 = vector.load %arg5[%c0_28, %c2, %c0_29] : memref<2x8x32xf32, #tpu.memory_space<vmem>>, vector<2x1x32xf32>
    %111 = vector.shape_cast %110 : vector<2x1x32xf32> to vector<2x32xf32>
    %112 = vector.shape_cast %109 : vector<2x32xf32> to vector<2x1x32xf32>
    tpu.vector_store %arg5[%c0_28, %c2, %c0_29], %112 {strides = array<i32>} : memref<2x8x32xf32, #tpu.memory_space<vmem>>, vector<2x1x32xf32>,
    %113 = vector.extract_strided_slice %7 {offsets = [0, 3, 0], sizes = [2, 1, 96], strides = [1, 1, 1]} : vector<2x8x96xf32> to vector<2x1x96xf32>
    %114 = vector.shape_cast %113 : vector<2x1x96xf32> to vector<2x96xf32>
    %cst_30 = arith.constant dense<0.000000e+00> : vector<2x96xf32>
    %115 = tpu.matmul %109, %8, %cst_30 {dimension_numbers = #tpu.dot_dimension_numbers<[1], [0], [0], [1], [0, 0, 1, 1], [], []>} : vector<2x32xf32>, vector<32x96xf32>, vector<2x96xf32> -> vector<2x96xf32>
    %116 = vector.extract_strided_slice %114 {offsets = [0, 0], sizes = [2, 32], strides = [1, 1]} : vector<2x96xf32> to vector<2x32xf32>
    %117 = vector.extract_strided_slice %115 {offsets = [0, 0], sizes = [2, 32], strides = [1, 1]} : vector<2x96xf32> to vector<2x32xf32>
    %118 = arith.addf %116, %117 : vector<2x32xf32>
    %119 = arith.negf %118 : vector<2x32xf32>
    %120 = math.exp %119 : vector<2x32xf32>
    %cst_31 = arith.constant 1.000000e+00 : f32
    %121 = vector.broadcast %cst_31 : f32 to vector<2x32xf32>
    %122 = arith.addf %121, %120 : vector<2x32xf32>
    %123 = arith.divf %121, %122 : vector<2x32xf32>
    %124 = vector.extract_strided_slice %114 {offsets = [0, 32], sizes = [2, 32], strides = [1, 1]} : vector<2x96xf32> to vector<2x32xf32>
    %125 = vector.extract_strided_slice %115 {offsets = [0, 32], sizes = [2, 32], strides = [1, 1]} : vector<2x96xf32> to vector<2x32xf32>
    %126 = arith.addf %124, %125 : vector<2x32xf32>
    %127 = arith.negf %126 : vector<2x32xf32>
    %128 = math.exp %127 : vector<2x32xf32>
    %cst_32 = arith.constant 1.000000e+00 : f32
    %129 = vector.broadcast %cst_32 : f32 to vector<2x32xf32>
    %130 = arith.addf %129, %128 : vector<2x32xf32>
    %131 = arith.divf %129, %130 : vector<2x32xf32>
    %132 = vector.extract_strided_slice %114 {offsets = [0, 64], sizes = [2, 32], strides = [1, 1]} : vector<2x96xf32> to vector<2x32xf32>
    %133 = vector.extract_strided_slice %115 {offsets = [0, 64], sizes = [2, 32], strides = [1, 1]} : vector<2x96xf32> to vector<2x32xf32>
    %134 = vector.broadcast %9 : vector<1x32xf32> to vector<2x32xf32>
    %135 = arith.addf %133, %134 : vector<2x32xf32>
    %136 = arith.mulf %123, %135 : vector<2x32xf32>
    %137 = arith.addf %132, %136 : vector<2x32xf32>
    %138 = math.tanh %137 : vector<2x32xf32>
    %cst_33 = arith.constant 1.000000e+00 : f32
    %139 = vector.broadcast %cst_33 : f32 to vector<2x32xf32>
    %140 = arith.subf %139, %131 : vector<2x32xf32>
    %141 = arith.mulf %140, %138 : vector<2x32xf32>
    %142 = arith.mulf %131, %109 : vector<2x32xf32>
    %143 = arith.addf %141, %142 : vector<2x32xf32>
    %c0_34 = arith.constant 0 : index
    %c3 = arith.constant 3 : index
    %c0_35 = arith.constant 0 : index
    %144 = vector.load %arg5[%c0_34, %c3, %c0_35] : memref<2x8x32xf32, #tpu.memory_space<vmem>>, vector<2x1x32xf32>
    %145 = vector.shape_cast %144 : vector<2x1x32xf32> to vector<2x32xf32>
    %146 = vector.shape_cast %143 : vector<2x32xf32> to vector<2x1x32xf32>
    tpu.vector_store %arg5[%c0_34, %c3, %c0_35], %146 {strides = array<i32>} : memref<2x8x32xf32, #tpu.memory_space<vmem>>, vector<2x1x32xf32>,
    %147 = vector.extract_strided_slice %7 {offsets = [0, 4, 0], sizes = [2, 1, 96], strides = [1, 1, 1]} : vector<2x8x96xf32> to vector<2x1x96xf32>
    %148 = vector.shape_cast %147 : vector<2x1x96xf32> to vector<2x96xf32>
    %cst_36 = arith.constant dense<0.000000e+00> : vector<2x96xf32>
    %149 = tpu.matmul %143, %8, %cst_36 {dimension_numbers = #tpu.dot_dimension_numbers<[1], [0], [0], [1], [0, 0, 1, 1], [], []>} : vector<2x32xf32>, vector<32x96xf32>, vector<2x96xf32> -> vector<2x96xf32>
    %150 = vector.extract_strided_slice %148 {offsets = [0, 0], sizes = [2, 32], strides = [1, 1]} : vector<2x96xf32> to vector<2x32xf32>
    %151 = vector.extract_strided_slice %149 {offsets = [0, 0], sizes = [2, 32], strides = [1, 1]} : vector<2x96xf32> to vector<2x32xf32>
    %152 = arith.addf %150, %151 : vector<2x32xf32>
    %153 = arith.negf %152 : vector<2x32xf32>
    %154 = math.exp %153 : vector<2x32xf32>
    %cst_37 = arith.constant 1.000000e+00 : f32
    %155 = vector.broadcast %cst_37 : f32 to vector<2x32xf32>
    %156 = arith.addf %155, %154 : vector<2x32xf32>
    %157 = arith.divf %155, %156 : vector<2x32xf32>
    %158 = vector.extract_strided_slice %148 {offsets = [0, 32], sizes = [2, 32], strides = [1, 1]} : vector<2x96xf32> to vector<2x32xf32>
    %159 = vector.extract_strided_slice %149 {offsets = [0, 32], sizes = [2, 32], strides = [1, 1]} : vector<2x96xf32> to vector<2x32xf32>
    %160 = arith.addf %158, %159 : vector<2x32xf32>
    %161 = arith.negf %160 : vector<2x32xf32>
    %162 = math.exp %161 : vector<2x32xf32>
    %cst_38 = arith.constant 1.000000e+00 : f32
    %163 = vector.broadcast %cst_38 : f32 to vector<2x32xf32>
    %164 = arith.addf %163, %162 : vector<2x32xf32>
    %165 = arith.divf %163, %164 : vector<2x32xf32>
    %166 = vector.extract_strided_slice %148 {offsets = [0, 64], sizes = [2, 32], strides = [1, 1]} : vector<2x96xf32> to vector<2x32xf32>
    %167 = vector.extract_strided_slice %149 {offsets = [0, 64], sizes = [2, 32], strides = [1, 1]} : vector<2x96xf32> to vector<2x32xf32>
    %168 = vector.broadcast %9 : vector<1x32xf32> to vector<2x32xf32>
    %169 = arith.addf %167, %168 : vector<2x32xf32>
    %170 = arith.mulf %157, %169 : vector<2x32xf32>
    %171 = arith.addf %166, %170 : vector<2x32xf32>
    %172 = math.tanh %171 : vector<2x32xf32>
    %cst_39 = arith.constant 1.000000e+00 : f32
    %173 = vector.broadcast %cst_39 : f32 to vector<2x32xf32>
    %174 = arith.subf %173, %165 : vector<2x32xf32>
    %175 = arith.mulf %174, %172 : vector<2x32xf32>
    %176 = arith.mulf %165, %143 : vector<2x32xf32>
    %177 = arith.addf %175, %176 : vector<2x32xf32>
    %c0_40 = arith.constant 0 : index
    %c4 = arith.constant 4 : index
    %c0_41 = arith.constant 0 : index
    %178 = vector.load %arg5[%c0_40, %c4, %c0_41] : memref<2x8x32xf32, #tpu.memory_space<vmem>>, vector<2x1x32xf32>
    %179 = vector.shape_cast %178 : vector<2x1x32xf32> to vector<2x32xf32>
    %180 = vector.shape_cast %177 : vector<2x32xf32> to vector<2x1x32xf32>
    tpu.vector_store %arg5[%c0_40, %c4, %c0_41], %180 {strides = array<i32>} : memref<2x8x32xf32, #tpu.memory_space<vmem>>, vector<2x1x32xf32>,
    %181 = vector.extract_strided_slice %7 {offsets = [0, 5, 0], sizes = [2, 1, 96], strides = [1, 1, 1]} : vector<2x8x96xf32> to vector<2x1x96xf32>
    %182 = vector.shape_cast %181 : vector<2x1x96xf32> to vector<2x96xf32>
    %cst_42 = arith.constant dense<0.000000e+00> : vector<2x96xf32>
    %183 = tpu.matmul %177, %8, %cst_42 {dimension_numbers = #tpu.dot_dimension_numbers<[1], [0], [0], [1], [0, 0, 1, 1], [], []>} : vector<2x32xf32>, vector<32x96xf32>, vector<2x96xf32> -> vector<2x96xf32>
    %184 = vector.extract_strided_slice %182 {offsets = [0, 0], sizes = [2, 32], strides = [1, 1]} : vector<2x96xf32> to vector<2x32xf32>
    %185 = vector.extract_strided_slice %183 {offsets = [0, 0], sizes = [2, 32], strides = [1, 1]} : vector<2x96xf32> to vector<2x32xf32>
    %186 = arith.addf %184, %185 : vector<2x32xf32>
    %187 = arith.negf %186 : vector<2x32xf32>
    %188 = math.exp %187 : vector<2x32xf32>
    %cst_43 = arith.constant 1.000000e+00 : f32
    %189 = vector.broadcast %cst_43 : f32 to vector<2x32xf32>
    %190 = arith.addf %189, %188 : vector<2x32xf32>
    %191 = arith.divf %189, %190 : vector<2x32xf32>
    %192 = vector.extract_strided_slice %182 {offsets = [0, 32], sizes = [2, 32], strides = [1, 1]} : vector<2x96xf32> to vector<2x32xf32>
    %193 = vector.extract_strided_slice %183 {offsets = [0, 32], sizes = [2, 32], strides = [1, 1]} : vector<2x96xf32> to vector<2x32xf32>
    %194 = arith.addf %192, %193 : vector<2x32xf32>
    %195 = arith.negf %194 : vector<2x32xf32>
    %196 = math.exp %195 : vector<2x32xf32>
    %cst_44 = arith.constant 1.000000e+00 : f32
    %197 = vector.broadcast %cst_44 : f32 to vector<2x32xf32>
    %198 = arith.addf %197, %196 : vector<2x32xf32>
    %199 = arith.divf %197, %198 : vector<2x32xf32>
    %200 = vector.extract_strided_slice %182 {offsets = [0, 64], sizes = [2, 32], strides = [1, 1]} : vector<2x96xf32> to vector<2x32xf32>
    %201 = vector.extract_strided_slice %183 {offsets = [0, 64], sizes = [2, 32], strides = [1, 1]} : vector<2x96xf32> to vector<2x32xf32>
    %202 = vector.broadcast %9 : vector<1x32xf32> to vector<2x32xf32>
    %203 = arith.addf %201, %202 : vector<2x32xf32>
    %204 = arith.mulf %191, %203 : vector<2x32xf32>
    %205 = arith.addf %200, %204 : vector<2x32xf32>
    %206 = math.tanh %205 : vector<2x32xf32>
    %cst_45 = arith.constant 1.000000e+00 : f32
    %207 = vector.broadcast %cst_45 : f32 to vector<2x32xf32>
    %208 = arith.subf %207, %199 : vector<2x32xf32>
    %209 = arith.mulf %208, %206 : vector<2x32xf32>
    %210 = arith.mulf %199, %177 : vector<2x32xf32>
    %211 = arith.addf %209, %210 : vector<2x32xf32>
    %c0_46 = arith.constant 0 : index
    %c5 = arith.constant 5 : index
    %c0_47 = arith.constant 0 : index
    %212 = vector.load %arg5[%c0_46, %c5, %c0_47] : memref<2x8x32xf32, #tpu.memory_space<vmem>>, vector<2x1x32xf32>
    %213 = vector.shape_cast %212 : vector<2x1x32xf32> to vector<2x32xf32>
    %214 = vector.shape_cast %211 : vector<2x32xf32> to vector<2x1x32xf32>
    tpu.vector_store %arg5[%c0_46, %c5, %c0_47], %214 {strides = array<i32>} : memref<2x8x32xf32, #tpu.memory_space<vmem>>, vector<2x1x32xf32>,
    %215 = vector.extract_strided_slice %7 {offsets = [0, 6, 0], sizes = [2, 1, 96], strides = [1, 1, 1]} : vector<2x8x96xf32> to vector<2x1x96xf32>
    %216 = vector.shape_cast %215 : vector<2x1x96xf32> to vector<2x96xf32>
    %cst_48 = arith.constant dense<0.000000e+00> : vector<2x96xf32>
    %217 = tpu.matmul %211, %8, %cst_48 {dimension_numbers = #tpu.dot_dimension_numbers<[1], [0], [0], [1], [0, 0, 1, 1], [], []>} : vector<2x32xf32>, vector<32x96xf32>, vector<2x96xf32> -> vector<2x96xf32>
    %218 = vector.extract_strided_slice %216 {offsets = [0, 0], sizes = [2, 32], strides = [1, 1]} : vector<2x96xf32> to vector<2x32xf32>
    %219 = vector.extract_strided_slice %217 {offsets = [0, 0], sizes = [2, 32], strides = [1, 1]} : vector<2x96xf32> to vector<2x32xf32>
    %220 = arith.addf %218, %219 : vector<2x32xf32>
    %221 = arith.negf %220 : vector<2x32xf32>
    %222 = math.exp %221 : vector<2x32xf32>
    %cst_49 = arith.constant 1.000000e+00 : f32
    %223 = vector.broadcast %cst_49 : f32 to vector<2x32xf32>
    %224 = arith.addf %223, %222 : vector<2x32xf32>
    %225 = arith.divf %223, %224 : vector<2x32xf32>
    %226 = vector.extract_strided_slice %216 {offsets = [0, 32], sizes = [2, 32], strides = [1, 1]} : vector<2x96xf32> to vector<2x32xf32>
    %227 = vector.extract_strided_slice %217 {offsets = [0, 32], sizes = [2, 32], strides = [1, 1]} : vector<2x96xf32> to vector<2x32xf32>
    %228 = arith.addf %226, %227 : vector<2x32xf32>
    %229 = arith.negf %228 : vector<2x32xf32>
    %230 = math.exp %229 : vector<2x32xf32>
    %cst_50 = arith.constant 1.000000e+00 : f32
    %231 = vector.broadcast %cst_50 : f32 to vector<2x32xf32>
    %232 = arith.addf %231, %230 : vector<2x32xf32>
    %233 = arith.divf %231, %232 : vector<2x32xf32>
    %234 = vector.extract_strided_slice %216 {offsets = [0, 64], sizes = [2, 32], strides = [1, 1]} : vector<2x96xf32> to vector<2x32xf32>
    %235 = vector.extract_strided_slice %217 {offsets = [0, 64], sizes = [2, 32], strides = [1, 1]} : vector<2x96xf32> to vector<2x32xf32>
    %236 = vector.broadcast %9 : vector<1x32xf32> to vector<2x32xf32>
    %237 = arith.addf %235, %236 : vector<2x32xf32>
    %238 = arith.mulf %225, %237 : vector<2x32xf32>
    %239 = arith.addf %234, %238 : vector<2x32xf32>
    %240 = math.tanh %239 : vector<2x32xf32>
    %cst_51 = arith.constant 1.000000e+00 : f32
    %241 = vector.broadcast %cst_51 : f32 to vector<2x32xf32>
    %242 = arith.subf %241, %233 : vector<2x32xf32>
    %243 = arith.mulf %242, %240 : vector<2x32xf32>
    %244 = arith.mulf %233, %211 : vector<2x32xf32>
    %245 = arith.addf %243, %244 : vector<2x32xf32>
    %c0_52 = arith.constant 0 : index
    %c6 = arith.constant 6 : index
    %c0_53 = arith.constant 0 : index
    %246 = vector.load %arg5[%c0_52, %c6, %c0_53] : memref<2x8x32xf32, #tpu.memory_space<vmem>>, vector<2x1x32xf32>
    %247 = vector.shape_cast %246 : vector<2x1x32xf32> to vector<2x32xf32>
    %248 = vector.shape_cast %245 : vector<2x32xf32> to vector<2x1x32xf32>
    tpu.vector_store %arg5[%c0_52, %c6, %c0_53], %248 {strides = array<i32>} : memref<2x8x32xf32, #tpu.memory_space<vmem>>, vector<2x1x32xf32>,
    %249 = vector.extract_strided_slice %7 {offsets = [0, 7, 0], sizes = [2, 1, 96], strides = [1, 1, 1]} : vector<2x8x96xf32> to vector<2x1x96xf32>
    %250 = vector.shape_cast %249 : vector<2x1x96xf32> to vector<2x96xf32>
    %cst_54 = arith.constant dense<0.000000e+00> : vector<2x96xf32>
    %251 = tpu.matmul %245, %8, %cst_54 {dimension_numbers = #tpu.dot_dimension_numbers<[1], [0], [0], [1], [0, 0, 1, 1], [], []>} : vector<2x32xf32>, vector<32x96xf32>, vector<2x96xf32> -> vector<2x96xf32>
    %252 = vector.extract_strided_slice %250 {offsets = [0, 0], sizes = [2, 32], strides = [1, 1]} : vector<2x96xf32> to vector<2x32xf32>
    %253 = vector.extract_strided_slice %251 {offsets = [0, 0], sizes = [2, 32], strides = [1, 1]} : vector<2x96xf32> to vector<2x32xf32>
    %254 = arith.addf %252, %253 : vector<2x32xf32>
    %255 = arith.negf %254 : vector<2x32xf32>
    %256 = math.exp %255 : vector<2x32xf32>
    %cst_55 = arith.constant 1.000000e+00 : f32
    %257 = vector.broadcast %cst_55 : f32 to vector<2x32xf32>
    %258 = arith.addf %257, %256 : vector<2x32xf32>
    %259 = arith.divf %257, %258 : vector<2x32xf32>
    %260 = vector.extract_strided_slice %250 {offsets = [0, 32], sizes = [2, 32], strides = [1, 1]} : vector<2x96xf32> to vector<2x32xf32>
    %261 = vector.extract_strided_slice %251 {offsets = [0, 32], sizes = [2, 32], strides = [1, 1]} : vector<2x96xf32> to vector<2x32xf32>
    %262 = arith.addf %260, %261 : vector<2x32xf32>
    %263 = arith.negf %262 : vector<2x32xf32>
    %264 = math.exp %263 : vector<2x32xf32>
    %cst_56 = arith.constant 1.000000e+00 : f32
    %265 = vector.broadcast %cst_56 : f32 to vector<2x32xf32>
    %266 = arith.addf %265, %264 : vector<2x32xf32>
    %267 = arith.divf %265, %266 : vector<2x32xf32>
    %268 = vector.extract_strided_slice %250 {offsets = [0, 64], sizes = [2, 32], strides = [1, 1]} : vector<2x96xf32> to vector<2x32xf32>
    %269 = vector.extract_strided_slice %251 {offsets = [0, 64], sizes = [2, 32], strides = [1, 1]} : vector<2x96xf32> to vector<2x32xf32>
    %270 = vector.broadcast %9 : vector<1x32xf32> to vector<2x32xf32>
    %271 = arith.addf %269, %270 : vector<2x32xf32>
    %272 = arith.mulf %259, %271 : vector<2x32xf32>
    %273 = arith.addf %268, %272 : vector<2x32xf32>
    %274 = math.tanh %273 : vector<2x32xf32>
    %cst_57 = arith.constant 1.000000e+00 : f32
    %275 = vector.broadcast %cst_57 : f32 to vector<2x32xf32>
    %276 = arith.subf %275, %267 : vector<2x32xf32>
    %277 = arith.mulf %276, %274 : vector<2x32xf32>
    %278 = arith.mulf %267, %245 : vector<2x32xf32>
    %279 = arith.addf %277, %278 : vector<2x32xf32>
    %c0_58 = arith.constant 0 : index
    %c7 = arith.constant 7 : index
    %c0_59 = arith.constant 0 : index
    %280 = vector.load %arg5[%c0_58, %c7, %c0_59] : memref<2x8x32xf32, #tpu.memory_space<vmem>>, vector<2x1x32xf32>
    %281 = vector.shape_cast %280 : vector<2x1x32xf32> to vector<2x32xf32>
    %282 = vector.shape_cast %279 : vector<2x32xf32> to vector<2x1x32xf32>
    tpu.vector_store %arg5[%c0_58, %c7, %c0_59], %282 {strides = array<i32>} : memref<2x8x32xf32, #tpu.memory_space<vmem>>, vector<2x1x32xf32>,
    return
  }
}

</mosaic_0001>

<bundles_post_ra>
// kernel: rdm_forward.1
= control target key start
LH: loop header
LB: loop body
LE: loop exit
PB: predicated region body
PF: predicated region fallthrough
CT: control target
= control target key end

     0   :  { %10 = vsyncpa [#allocation3], 0  ;;  %s2181_s0 = inlined_call_operand.hbm [shape: f32[2,8,32], index: 0, kind: input, shape index: {}]   ;;  %s2182_s1 = inlined_call_operand.hbm [shape: f32[32,96], index: 1, kind: input, shape index: {}]   ;;  %s2183_s2 = inlined_call_operand.hbm [shape: f32[32,96], index: 2, kind: input, shape index: {}]   ;;  %s2184_s3 = inlined_call_operand.vmem [shape: f32[1,96], index: 3, kind: input, shape index: {}]   ;;  %s2185_s4 = inlined_call_operand.vmem [shape: f32[1,32], index: 4, kind: input, shape index: {}]   ;;  %s2186_s5 = inlined_call_operand.hbm [shape: f32[2,8,32], index: 5, kind: output, shape index: {}]  }
   0x1   :  { %11 = vsyncpa [#allocation6], 0 }
   0x2   :  { %12 = vsyncpa [#allocation4], 0  ;;  %s1811_s18 = smov [#allocation5]   ;;  %s1812_s20 = smov [#allocation2]  }
   0x3   :  { %s30_s19 = sshll.u32 %s1811_s18, 4  ;;  %s18_s21 = sshll.u32 %s1812_s20, 4  ;;  %s31_s19 = int_to_ptr.vmem [resolvable:$true] %s30_s19  ;;  %s1852_s21 = int_to_ptr.vmem [resolvable:$true] %s18_s21 }
   0x4   :  { %s1717_s24 = scalar_lea.hbm %s2182_s1, 512 }
   0x5   :  { %p1718_p0 = scmp.ne.s32.totalorder %s2182_s1, %s1717_s24  ;;  %p1721_p1 = scmp.lt.u32.totalorder %s1717_s24, %s2182_s1 }
   0x7   :  { %p1723_p2 = pnand %p1721_p1, %p1718_p0 }
   0x9   :  { %1726 = shalt.err (!%p1723_p2)
}
   0xa   :  { %s1727_s29 = scalar_lea.vmem %s31_s19, 512  ;;  %p1732_p4 = scmp.lt.s32.totalorder %s31_s19, %s31_s19 }
   0xb   :  { %p1728_p3 = scmp.ne.s32.totalorder %s31_s19, %s1727_s29  ;;  %p1733_p5 = scmp.lt.s32.totalorder %s1727_s29, %s1727_s29 }
   0xd   :  { %p1734_p6 = por %p1733_p5, %p1732_p4 }
   0xf   :  { %p1735_p7 = pnand %p1734_p6, %p1728_p3 }
  0x11   :  { %1738 = shalt.err (!%p1735_p7)
}
  0x12   :  { %s1813_s30 = smov 128   ;;  %s1814_s6 = smov 8  }
  0x13   :  { %36 = dma.hbm_to_vmem [thread:$0]  %s2182_s1, 512, %s31_s19, [#allocation6], %s1813_s30, %s1813_s30, %s1814_s6  }
  0x14   :  { %s1739_s11 = scalar_lea.hbm %s2181_s0, 256 }
  0x15   :  { %p1740_p8 = scmp.ne.s32.totalorder %s2181_s0, %s1739_s11  ;;  %p1743_p9 = scmp.lt.u32.totalorder %s1739_s11, %s2181_s0 }
  0x17   :  { %p1745_p10 = pnand %p1743_p9, %p1740_p8 }
  0x19   :  { %1748 = shalt.err (!%p1745_p10)
}
  0x1a   :  { %s1749_s16 = scalar_lea.vmem %s1852_s21, 256  ;;  %p1754_p12 = scmp.lt.s32.totalorder %s1852_s21, %s1852_s21 }
  0x1b   :  { %p1750_p11 = scmp.ne.s32.totalorder %s1852_s21, %s1749_s16  ;;  %p1755_p13 = scmp.lt.s32.totalorder %s1749_s16, %s1749_s16 }
  0x1d   :  { %p1756_p0 = por %p1755_p13, %p1754_p12 }
  0x1f   :  { %p1757_p1 = pnand %p1756_p0, %p1750_p11 }
  0x21   :  { %1760 = shalt.err (!%p1757_p1)
}
  0x22   :  { %24 = dma.hbm_to_vmem [thread:$0]  %s2181_s0, 256, %s1852_s21, [#allocation3], %s1813_s30, %s1813_s30, %s1814_s6  }
  0x23   :  { %s1815_s18 = smov [#allocation7]   ;;  %s1761_s23 = scalar_lea.hbm %s2183_s2, 512 }
  0x24   :  { %s42_s19 = sshll.u32 %s1815_s18, 4  ;;  %p1762_p2 = scmp.ne.s32.totalorder %s2183_s2, %s1761_s23  ;;  %s43_s19 = int_to_ptr.vmem [resolvable:$true] %s42_s19 }
  0x25   :  { %p1765_p3 = scmp.lt.u32.totalorder %s1761_s23, %s2183_s2 }
  0x27   :  { %p1767_p4 = pnand %p1765_p3, %p1762_p2 }
  0x29   :  { %1770 = shalt.err (!%p1767_p4)
}
  0x2a   :  { %s1771_s28 = scalar_lea.vmem %s43_s19, 512  ;;  %p1776_p6 = scmp.lt.s32.totalorder %s43_s19, %s43_s19 }
  0x2b   :  { %p1772_p5 = scmp.ne.s32.totalorder %s43_s19, %s1771_s28  ;;  %p1777_p7 = scmp.lt.s32.totalorder %s1771_s28, %s1771_s28 }
  0x2d   :  { %p1778_p8 = por %p1777_p7, %p1776_p6 }
  0x2f   :  { %p1779_p9 = pnand %p1778_p8, %p1772_p5 }
  0x31   :  { %1782 = shalt.err (!%p1779_p9)
}
  0x32   :  { %48 = dma.hbm_to_vmem [thread:$0]  %s2183_s2, 512, %s43_s19, [#allocation6], %s1813_s30, %s1813_s30, %s1814_s6  }
  0x33   :  { %1805 = dma.done.wait [#allocation3], 256  }
  0x34   :  { %1806 = vsyncadd [#allocation3], 4294967040 }
  0x35   :  { %1807 = dma.done.wait [#allocation6], 1024  }
  0x36   :  { %1808 = vsyncadd [#allocation6], 4294966272  ;;  %v1816_v0 = vmov 0.0|0.0   ;;  %vm1817_vm0 = vmmov 0   ;;  %v1818_v1 = vmov 0.0   ;;  %v64_v2 = vld [vmem:[#allocation5] sm:$0xff] }
  0x37   :  { %1562 = vmatprep.subr.bf16.mxu1 %v1816_v0  ;;  %1474 = vmatprep.mubr.msk.f32.mxu1 %vm1817_vm0, %v1818_v1  ;;  %v65_v3 = vld [vmem:[#allocation5 + $0x8] sm:$0xff]  ;;  %v157_v4 = vld [vmem:[#allocation7] sm:$0xff]  ;;  %vm75_vm1 = vcmask 261120   ;;  %v66_v7 = vld [vmem:[#allocation5 + $0x10] sm:$0xff]  ;;  %s1819_s7 = smov 64   ;;  %vm312_vm2 = vcmask 1041409  }
  0x38   :  { %v1554_v5 = vpack.c.bf16 %v65_v3, %v64_v2  ;;  %v158_v6 = vld [vmem:[#allocation7 + $0x8] sm:$0xff]  ;;  %v67_v8 = vld [vmem:[#allocation5 + $0x18] sm:$0xff]  ;;  %v159_v11 = vld [vmem:[#allocation7 + $0x10] sm:$0xff]  ;;  %vm308_vm3 = vcmask 253952   ;;  %vm456_vm4 = vcmask 254977   ;;  %vm606_vm5 = vcmask 256002  }
  0x39   :  { %v1907_v9 = vpack.c.bf16 %v158_v6, %v157_v4  ;;  %v1558_v10 = vpack.c.bf16 %v67_v8, %v66_v7  ;;  %v160_v12 = vld [vmem:[#allocation7 + $0x18] sm:$0xff]  ;;  %v62_v13 = vld [vmem:[#allocation2] sm:$0xff]  ;;  %vm757_vm6 = vcmask 257027   ;;  %vm908_vm7 = vcmask 258052   ;;  %s1821_s9 = smov [#allocation8]  }
  0x3a   :  { %1555 = vmatprep.subr.bf16.mxu0 %v1554_v5  ;;  %1463 = vmatprep.mubr.msk.f32.mxu0 %vm75_vm1, %v62_v13  ;;  %v1387_v14 = vld [vmem:[%s2185_s4] ss:$0 sm:$0xff]  ;;  %v1914_v15 = vpack.c.bf16 %v160_v12, %v159_v11  ;;  %v63_v16 = vld [vmem:[#allocation2 + $0x8] sm:$0xff]  ;;  %vm1059_vm8 = vcmask 259077   ;;  %vm1210_vm9 = vcmask 260102   ;;  %s1369_s10 = sshll.u32 %s1821_s9, 4  ;;  %s1370_s10 = int_to_ptr.vmem [resolvable:$true] %s1369_s10 }
  0x3b   :  { %1564 = vmatpush3.bf16.msra.mxu1 %v1907_v9  ;;  %1557 = vmatpush3.bf16.msra.mxu0 %v1554_v5  ;;  %v1382_v24 = vld [vmem:[%s2184_s3] ss:$0 sm:$0xff]  ;;  %s1820_s3 = smov 96   ;;  %vm1361_vm10 = vcmask 261127   ;;  %s1783_s11 = scalar_lea.vmem %s1370_s10, 256 }
  0x3c   :  { %1565 = vmatprep.subr.bf16.mxu1 %v1816_v0  ;;  %1559 = vmatprep.subr.bf16.mxu0 %v1558_v10  ;;  %p1784_p10 = scmp.ne.s32.totalorder %s1370_s10, %s1783_s11  ;;  %p1788_p11 = scmp.lt.s32.totalorder %s1370_s10, %s1370_s10 }
  0x3d   :  { %258 = vrot.lane.b32.xlu0 %v1387_v14, %s1819_s7  ;;  %p1789_p12 = scmp.lt.s32.totalorder %s1783_s11, %s1783_s11 }
  0x3f   :  { %1567 = vmatpush3.bf16.msra.mxu1 %v1914_v15  ;;  %1561 = vmatpush3.bf16.msra.mxu0 %v1558_v10  ;;  %p1790_p13 = por %p1789_p12, %p1788_p11 }
  0x40   :  { %1568 = vmatprep.subr.bf16.mxu0 %v1816_v0  ;;  %1574 = vmatprep.subr.bf16.mxu1 %v1816_v0 }
  0x41   :  { %p1791_p0 = pnand %p1790_p13, %p1784_p10 }
  0x42   :  { %1475 = vmatmul.mubr.f32.vlgmr.msra.gmra.mrb[0].mxu1 %v1818_v1  ;;  %1464 = vmatmul.mubr.msk.f32.vlgmr.msra.gmra.mrb[0].mxu0 %vm75_vm1, %v63_v16 }
  0x43   :  { %1570 = vmatpush3.bf16.msra.mxu0 %v1907_v9  ;;  %1485 = vmatprep.mubr.msk.f32.mxu0 %vm1817_vm0, %v1818_v1 }
  0x44   :  { %1571 = vmatprep.subr.bf16.mxu0 %v1816_v0  ;;  %1576 = vmatpush3.bf16.msra.mxu1 %v1907_v9 }
  0x45   :  { %1577 = vmatprep.subr.bf16.mxu1 %v1816_v0  ;;  %1496 = vmatprep.mubr.msk.f32.mxu1 %vm1817_vm0, %v1818_v1 }
  0x47   :  { %1573 = vmatpush3.bf16.msra.mxu0 %v1914_v15 }
  0x48   :  { %1579 = vmatpush3.bf16.msra.mxu1 %v1914_v15  ;;  %1580 = vmatprep.subr.bf16.mxu0 %v1816_v0 }
  0x49   :  { %1586 = vmatprep.subr.bf16.mxu1 %v1816_v0 }
  0xaf   :  { %v1935_v17 = vpop.permute.xlu0 %258 }
 0x115   :  { %v231_v18 = vpop.f32.mrb[0].mxu1  ;;  %v1465_v19 = vpop.f32.mrb[0].mxu0 }
 0x116   :  { %v1476_v20 = vpop.f32.mrb[1].mxu1  ;;  %v148_v21 = vpop.f32.mrb[1].mxu0  ;;  %v261_v22 = vadd.f32 %v1935_v17, %v231_v18  ;;  %v236_v26 = vrot.slane %v231_v18, 1  ;;  %v1945_v27 = vadd.f32 %v1465_v19, %v1382_v24 }
 0x117   :  { %v1943_v25 = vadd.f32 %v1382_v24, %v148_v21 }
 0x118   :  { %264 = vrot.lane.b32.xlu1 %v261_v22, %s1819_s7  ;;  %v263_v23 = vrot.slane %v261_v22, 1  ;;  %v240_v29 = vadd.f32 %v236_v26, %v1945_v27 }
 0x119   :  { %v239_v28 = vadd.f32 %v231_v18, %v1943_v25 }
 0x11a   :  { %266 = vrot.lane.b32.xlu0 %v263_v23, %s1819_s7  ;;  %v1386_v31 = vmul.f32 -1.442695, %v240_v29 }
 0x11b   :  { %v1385_v30 = vmul.f32 -1.442695, %v239_v28 }
 0x11d   :  { %1621 = vpow2.f32 %v1385_v30 }
 0x11e   :  { %1623 = vpow2.f32 %v1386_v31 }
 0x127   :  { %v1622_v32 = vpop.eup %1621 }
 0x128   :  { %v1624_v33 = vpop.eup %1623  ;;  %v247_v34 = vadd.f32 1.0, %v1622_v32 }
 0x129   :  { %v248_v35 = vadd.f32 1.0, %v1624_v33 }
 0x12a   :  { %1625 = vrcp.f32 %v247_v34 }
 0x12b   :  { %1627 = vrcp.f32 %v248_v35 }
 0x134   :  { %v1626_v36 = vpop.eup %1625 }
 0x135   :  { %v1628_v39 = vpop.eup %1627  ;;  %v284_v49 = vsub.f32 1.0, %v1626_v36  ;;  %v296_v55 = vmul.f32 0.0, %v1626_v36 }
 0x136   :  { %v285_v50 = vsub.f32 1.0, %v1628_v39  ;;  %v297_v53 = vmul.f32 0.0, %v1628_v39 }
 0x18a   :  { %v265_v37 = vpop.permute.xlu1 %264 }
 0x18b   :  { %v270_v38 = vmul.f32 %v1626_v36, %v265_v37 }
 0x18c   :  { %v267_v40 = vpop.permute.xlu0 %266 }
 0x18d   :  { %v271_v41 = vmul.f32 %v1628_v39, %v267_v40  ;;  %274 = vrot.lane.b32.xlu0 %v270_v38, %s1819_s7 }
 0x18f   :  { %276 = vrot.lane.b32.xlu1 %v271_v41, %s1819_s7 }
 0x1ff   :  { %v275_v42 = vpop.permute.xlu0 %274 }
 0x200   :  { %v280_v43 = vadd.f32 %v275_v42, %v1943_v25 }
 0x201   :  { %v277_v44 = vpop.permute.xlu1 %276 }
 0x202   :  { %1629 = vtanh.f32 %v280_v43  ;;  %v281_v45 = vadd.f32 %v277_v44, %v1945_v27 }
 0x204   :  { %1631 = vtanh.f32 %v281_v45 }
 0x20c   :  { %v1630_v46 = vpop.eup %1629 }
 0x20d   :  { %288 = vrot.lane.b32.xlu0 %v1630_v46, %s1820_s3 }
 0x20e   :  { %v1632_v47 = vpop.eup %1631 }
 0x20f   :  { %290 = vrot.lane.b32.xlu1 %v1632_v47, %s1820_s3 }
 0x27f   :  { %v289_v48 = vpop.permute.xlu0 %288 }
 0x280   :  { %v294_v52 = vmul.f32 %v289_v48, %v284_v49 }
 0x281   :  { %v291_v51 = vpop.permute.xlu1 %290 }
 0x282   :  { %v295_v54 = vmul.f32 %v291_v51, %v285_v50  ;;  %v1957_v57 = vadd.f32 %v296_v55, %v294_v52 }
 0x284   :  { %v1955_v56 = vadd.f32 %v297_v53, %v295_v54  ;;  %v441_v32 = vrot.slane %v1957_v57, 7 }
 0x286   :  { %v311_v58 = vrot.slane %v1955_v56, 7 }
 0x288   :  { %v313_v59 = vsel %vm312_vm2, %v311_v58, %v1957_v57 }
 0x289   :  { %314 = vrot.lane.b32.xlu1 %v313_v59, %s1820_s3 }
 0x2fb   :  { %v315_v60 = vpop.permute.xlu1 %314 }
 0x2fc   :  { %1486 = vmatmul.mubr.msk.f32.vlgmr.msra.gmra.mrb[2].mxu0 %vm75_vm1, %v315_v60 }
 0x2fd   :  { %1582 = vmatpush3.bf16.msra.mxu0 %v1907_v9  ;;  %1507 = vmatprep.mubr.msk.f32.mxu0 %vm1817_vm0, %v1818_v1 }
 0x2fe   :  { %1583 = vmatprep.subr.bf16.mxu0 %v1816_v0 }
 0x301   :  { %1585 = vmatpush3.bf16.msra.mxu0 %v1914_v15 }
 0x302   :  { %1592 = vmatprep.subr.bf16.mxu0 %v1816_v0 }
 0x3cf   :  { %v384_v61 = vpop.f32.mrb[2].mxu0 }
 0x3d0   :  { %v406_v62 = vadd.f32 %v384_v61, %v1935_v17  ;;  %v1487_v63 = vpop.f32.mrb[3].mxu0  ;;  %v389_v3 = vrot.slane %v384_v61, 7  ;;  %v393_v4 = vadd.f32 %v384_v61, %v1945_v27 }
 0x3d2   :  { %411 = vrot.lane.b32.xlu1 %v406_v62, %s1819_s7  ;;  %v408_v2 = vrot.slane %v406_v62, 7  ;;  %v392_v5 = vadd.f32 %v389_v3, %v1943_v25  ;;  %v1390_v6 = vmul.f32 -1.442695, %v393_v4 }
 0x3d4   :  { %409 = vrot.lane.b32.xlu0 %v408_v2, %s1819_s7  ;;  %v1389_v7 = vmul.f32 -1.442695, %v392_v5  ;;  %1633 = vpow2.f32 %v1390_v6 }
 0x3d6   :  { %1635 = vpow2.f32 %v1389_v7 }
 0x3de   :  { %v1634_v8 = vpop.eup %1633 }
 0x3df   :  { %v401_v11 = vadd.f32 1.0, %v1634_v8 }
 0x3e0   :  { %v1636_v10 = vpop.eup %1635 }
 0x3e1   :  { %v400_v12 = vadd.f32 1.0, %v1636_v10  ;;  %1637 = vrcp.f32 %v401_v11 }
 0x3e3   :  { %1639 = vrcp.f32 %v400_v12 }
 0x3eb   :  { %v1638_v13 = vpop.eup %1637 }
 0x3ec   :  { %v430_v30 = vsub.f32 1.0, %v1638_v13  ;;  %v445_v37 = vmul.f32 %v1638_v13, %v311_v58 }
 0x3ed   :  { %v1640_v18 = vpop.eup %1639 }
 0x3ee   :  { %v429_v31 = vsub.f32 1.0, %v1640_v18  ;;  %v444_v35 = vmul.f32 %v1640_v18, %v441_v32 }
 0x444   :  { %v412_v14 = vpop.permute.xlu1 %411 }
 0x445   :  { %v416_v16 = vmul.f32 %v1638_v13, %v412_v14 }
 0x446   :  { %v410_v19 = vpop.permute.xlu0 %409 }
 0x447   :  { %v415_v20 = vmul.f32 %v1640_v18, %v410_v19  ;;  %421 = vrot.lane.b32.xlu1 %v416_v16, %s1819_s7 }
 0x449   :  { %419 = vrot.lane.b32.xlu0 %v415_v20, %s1819_s7 }
 0x4b9   :  { %v422_v21 = vpop.permute.xlu1 %421 }
 0x4ba   :  { %v426_v22 = vadd.f32 %v422_v21, %v1945_v27 }
 0x4bb   :  { %v420_v23 = vpop.permute.xlu0 %419 }
 0x4bc   :  { %1641 = vtanh.f32 %v426_v22  ;;  %v425_v24 = vadd.f32 %v420_v23, %v1943_v25 }
 0x4be   :  { %1643 = vtanh.f32 %v425_v24 }
 0x4c6   :  { %v1642_v26 = vpop.eup %1641 }
 0x4c7   :  { %435 = vrot.lane.b32.xlu1 %v1642_v26, %s1820_s3 }
 0x4c8   :  { %v1644_v28 = vpop.eup %1643 }
 0x4c9   :  { %433 = vrot.lane.b32.xlu0 %v1644_v28, %s1820_s3 }
 0x539   :  { %v436_v29 = vpop.permute.xlu1 %435 }
 0x53a   :  { %v440_v34 = vmul.f32 %v436_v29, %v430_v30 }
 0x53b   :  { %v434_v33 = vpop.permute.xlu0 %433 }
 0x53c   :  { %v439_v36 = vmul.f32 %v434_v33, %v429_v31  ;;  %v1984_v39 = vadd.f32 %v445_v37, %v440_v34 }
 0x53e   :  { %v1982_v38 = vadd.f32 %v444_v35, %v439_v36  ;;  %v591_v12 = vrot.slane %v1984_v39, 7 }
 0x540   :  { %v459_v40 = vrot.slane %v1982_v38, 1  ;;  %v590_v16 = vrot.slane %v1982_v38, 7 }
 0x542   :  { %v460_v41 = vsel %vm312_vm2, %v1984_v39, %v459_v40 }
 0x543   :  { %461 = vrot.lane.b32.xlu0 %v460_v41, %s1820_s3 }
 0x5b5   :  { %v462_v42 = vpop.permute.xlu0 %461 }
 0x5b6   :  { %1497 = vmatmul.mubr.msk.f32.vlgmr.msra.gmra.mrb[2].mxu1 %vm75_vm1, %v462_v42 }
 0x5b7   :  { %1588 = vmatpush3.bf16.msra.mxu1 %v1907_v9  ;;  %1518 = vmatprep.mubr.msk.f32.mxu1 %vm1817_vm0, %v1818_v1 }
 0x5b8   :  { %1589 = vmatprep.subr.bf16.mxu1 %v1816_v0 }
 0x5bb   :  { %1591 = vmatpush3.bf16.msra.mxu1 %v1914_v15 }
 0x5bc   :  { %1598 = vmatprep.subr.bf16.mxu1 %v1816_v0 }
 0x689   :  { %v531_v43 = vpop.f32.mrb[2].mxu1 }
 0x68a   :  { %v554_v44 = vadd.f32 %v531_v43, %v1935_v17  ;;  %v1498_v45 = vpop.f32.mrb[3].mxu1  ;;  %v536_v48 = vrot.slane %v531_v43, 6  ;;  %v537_v49 = vrot.slane %v531_v43, 7 }
 0x68c   :  { %v557_v46 = vrot.slane %v554_v44, 7  ;;  %v556_v47 = vrot.slane %v554_v44, 6  ;;  %v540_v50 = vadd.f32 %v536_v48, %v1943_v25  ;;  %v541_v51 = vadd.f32 %v537_v49, %v1945_v27 }
 0x68e   :  { %560 = vrot.lane.b32.xlu0 %v557_v46, %s1819_s7  ;;  %558 = vrot.lane.b32.xlu1 %v556_v47, %s1819_s7  ;;  %v1392_v52 = vmul.f32 -1.442695, %v540_v50  ;;  %v1393_v53 = vmul.f32 -1.442695, %v541_v51 }
 0x690   :  { %1645 = vpow2.f32 %v1392_v52 }
 0x691   :  { %1647 = vpow2.f32 %v1393_v53 }
 0x69a   :  { %v1646_v54 = vpop.eup %1645 }
 0x69b   :  { %v1648_v55 = vpop.eup %1647  ;;  %v548_v58 = vadd.f32 1.0, %v1646_v54 }
 0x69c   :  { %v549_v59 = vadd.f32 1.0, %v1648_v55 }
 0x69d   :  { %1649 = vrcp.f32 %v548_v58 }
 0x69e   :  { %1651 = vrcp.f32 %v549_v59 }
 0x6a7   :  { %v1650_v60 = vpop.eup %1649 }
 0x6a8   :  { %v1652_v61 = vpop.eup %1651  ;;  %v578_v14 = vsub.f32 1.0, %v1650_v60  ;;  %v594_v21 = vmul.f32 %v1650_v60, %v590_v16 }
 0x6a9   :  { %v579_v11 = vsub.f32 1.0, %v1652_v61  ;;  %v595_v18 = vmul.f32 %v1652_v61, %v591_v12 }
 0x700   :  { %v561_v62 = vpop.permute.xlu0 %560  ;;  %v559_v63 = vpop.permute.xlu1 %558 }
 0x701   :  { %v565_v2 = vmul.f32 %v1652_v61, %v561_v62  ;;  %v564_v3 = vmul.f32 %v1650_v60, %v559_v63 }
 0x703   :  { %570 = vrot.lane.b32.xlu0 %v565_v2, %s1819_s7  ;;  %568 = vrot.lane.b32.xlu1 %v564_v3, %s1819_s7 }
 0x775   :  { %v571_v4 = vpop.permute.xlu0 %570  ;;  %v569_v5 = vpop.permute.xlu1 %568 }
 0x776   :  { %v575_v6 = vadd.f32 %v571_v4, %v1945_v27  ;;  %v574_v7 = vadd.f32 %v569_v5, %v1943_v25 }
 0x778   :  { %1653 = vtanh.f32 %v575_v6 }
 0x779   :  { %1655 = vtanh.f32 %v574_v7 }
 0x782   :  { %v1654_v8 = vpop.eup %1653 }
 0x783   :  { %v1656_v10 = vpop.eup %1655  ;;  %584 = vrot.lane.b32.xlu0 %v1654_v8, %s1820_s3 }
 0x784   :  { %582 = vrot.lane.b32.xlu1 %v1656_v10, %s1820_s3 }
 0x7f5   :  { %v585_v13 = vpop.permute.xlu0 %584 }
 0x7f6   :  { %v589_v19 = vmul.f32 %v585_v13, %v579_v11  ;;  %v583_v20 = vpop.permute.xlu1 %582 }
 0x7f7   :  { %v588_v22 = vmul.f32 %v583_v20, %v578_v14 }
 0x7f8   :  { %v2010_v23 = vadd.f32 %v595_v18, %v589_v19 }
 0x7f9   :  { %v2012_v24 = vadd.f32 %v594_v21, %v588_v22 }
 0x7fa   :  { %v610_v26 = vrot.slane %v2010_v23, 1  ;;  %v742_v63 = vrot.slane %v2010_v23, 7 }
 0x7fb   :  { %v609_v28 = vrot.slane %v2012_v24, 2  ;;  %v741_v4 = vrot.slane %v2012_v24, 7 }
 0x7fd   :  { %v611_v29 = vsel %vm312_vm2, %v610_v26, %v609_v28 }
 0x7fe   :  { %612 = vrot.lane.b32.xlu1 %v611_v29, %s1820_s3 }
 0x870   :  { %v613_v30 = vpop.permute.xlu1 %612 }
 0x871   :  { %1508 = vmatmul.mubr.msk.f32.vlgmr.msra.gmra.mrb[4].mxu0 %vm75_vm1, %v613_v30 }
 0x872   :  { %1594 = vmatpush3.bf16.msra.mxu0 %v1907_v9  ;;  %1529 = vmatprep.mubr.msk.f32.mxu0 %vm1817_vm0, %v1818_v1 }
 0x873   :  { %1595 = vmatprep.subr.bf16.mxu0 %v1816_v0 }
 0x876   :  { %1597 = vmatpush3.bf16.msra.mxu0 %v1914_v15 }
 0x877   :  { %1604 = vmatprep.subr.bf16.mxu0 %v1816_v0 }
 0x944   :  { %v682_v31 = vpop.f32.mrb[4].mxu0 }
 0x945   :  { %v705_v32 = vadd.f32 %v682_v31, %v1935_v17  ;;  %v1509_v33 = vpop.f32.mrb[5].mxu0  ;;  %v687_v36 = vrot.slane %v682_v31, 5  ;;  %v688_v37 = vrot.slane %v682_v31, 6 }
 0x947   :  { %v708_v34 = vrot.slane %v705_v32, 6  ;;  %v707_v35 = vrot.slane %v705_v32, 5  ;;  %v691_v40 = vadd.f32 %v687_v36, %v1943_v25  ;;  %v692_v41 = vadd.f32 %v688_v37, %v1945_v27 }
 0x949   :  { %711 = vrot.lane.b32.xlu1 %v708_v34, %s1819_s7  ;;  %709 = vrot.lane.b32.xlu0 %v707_v35, %s1819_s7  ;;  %v1395_v42 = vmul.f32 -1.442695, %v691_v40  ;;  %v1396_v43 = vmul.f32 -1.442695, %v692_v41 }
 0x94b   :  { %1657 = vpow2.f32 %v1395_v42 }
 0x94c   :  { %1659 = vpow2.f32 %v1396_v43 }
 0x955   :  { %v1658_v44 = vpop.eup %1657 }
 0x956   :  { %v1660_v45 = vpop.eup %1659  ;;  %v699_v46 = vadd.f32 1.0, %v1658_v44 }
 0x957   :  { %v700_v47 = vadd.f32 1.0, %v1660_v45 }
 0x958   :  { %1661 = vrcp.f32 %v699_v46 }
 0x959   :  { %1663 = vrcp.f32 %v700_v47 }
 0x962   :  { %v1662_v48 = vpop.eup %1661 }
 0x963   :  { %v1664_v49 = vpop.eup %1663  ;;  %v729_v3 = vsub.f32 1.0, %v1662_v48  ;;  %v745_v8 = vmul.f32 %v1662_v48, %v741_v4 }
 0x964   :  { %v730_v62 = vsub.f32 1.0, %v1664_v49  ;;  %v746_v5 = vmul.f32 %v1664_v49, %v742_v63 }
 0x9bb   :  { %v712_v50 = vpop.permute.xlu1 %711  ;;  %v710_v51 = vpop.permute.xlu0 %709 }
 0x9bc   :  { %v716_v52 = vmul.f32 %v1664_v49, %v712_v50  ;;  %v715_v53 = vmul.f32 %v1662_v48, %v710_v51 }
 0x9be   :  { %721 = vrot.lane.b32.xlu1 %v716_v52, %s1819_s7  ;;  %719 = vrot.lane.b32.xlu0 %v715_v53, %s1819_s7 }
 0xa30   :  { %v722_v54 = vpop.permute.xlu1 %721  ;;  %v720_v55 = vpop.permute.xlu0 %719 }
 0xa31   :  { %v726_v58 = vadd.f32 %v722_v54, %v1945_v27  ;;  %v725_v59 = vadd.f32 %v720_v55, %v1943_v25 }
 0xa33   :  { %1665 = vtanh.f32 %v726_v58 }
 0xa34   :  { %1667 = vtanh.f32 %v725_v59 }
 0xa3d   :  { %v1666_v60 = vpop.eup %1665 }
 0xa3e   :  { %v1668_v61 = vpop.eup %1667  ;;  %735 = vrot.lane.b32.xlu1 %v1666_v60, %s1820_s3 }
 0xa3f   :  { %733 = vrot.lane.b32.xlu0 %v1668_v61, %s1820_s3 }
 0xab0   :  { %v736_v2 = vpop.permute.xlu1 %735 }
 0xab1   :  { %v740_v6 = vmul.f32 %v736_v2, %v730_v62  ;;  %v734_v7 = vpop.permute.xlu0 %733 }
 0xab2   :  { %v739_v10 = vmul.f32 %v734_v7, %v729_v3 }
 0xab3   :  { %v2038_v11 = vadd.f32 %v746_v5, %v740_v6 }
 0xab4   :  { %v2040_v12 = vadd.f32 %v745_v8, %v739_v10 }
 0xab5   :  { %v761_v13 = vrot.slane %v2038_v11, 2  ;;  %v893_v53 = vrot.slane %v2038_v11, 7 }
 0xab6   :  { %v760_v14 = vrot.slane %v2040_v12, 3  ;;  %v892_v58 = vrot.slane %v2040_v12, 7 }
 0xab8   :  { %v762_v16 = vsel %vm312_vm2, %v761_v13, %v760_v14 }
 0xab9   :  { %763 = vrot.lane.b32.xlu0 %v762_v16, %s1820_s3 }
 0xb2b   :  { %v764_v18 = vpop.permute.xlu0 %763 }
 0xb2c   :  { %1519 = vmatmul.mubr.msk.f32.vlgmr.msra.gmra.mrb[4].mxu1 %vm75_vm1, %v764_v18 }
 0xb2d   :  { %1600 = vmatpush3.bf16.msra.mxu1 %v1907_v9  ;;  %1540 = vmatprep.mubr.msk.f32.mxu1 %vm1817_vm0, %v1818_v1 }
 0xb2e   :  { %1601 = vmatprep.subr.bf16.mxu1 %v1816_v0 }
 0xb31   :  { %1603 = vmatpush3.bf16.msra.mxu1 %v1914_v15 }
 0xbff   :  { %v833_v19 = vpop.f32.mrb[4].mxu1 }
 0xc00   :  { %v856_v20 = vadd.f32 %v833_v19, %v1935_v17  ;;  %v1520_v21 = vpop.f32.mrb[5].mxu1  ;;  %v838_v28 = vrot.slane %v833_v19, 4  ;;  %v839_v29 = vrot.slane %v833_v19, 5 }
 0xc02   :  { %v859_v22 = vrot.slane %v856_v20, 5  ;;  %v858_v26 = vrot.slane %v856_v20, 4  ;;  %v842_v30 = vadd.f32 %v838_v28, %v1943_v25  ;;  %v843_v31 = vadd.f32 %v839_v29, %v1945_v27 }
 0xc04   :  { %862 = vrot.lane.b32.xlu0 %v859_v22, %s1819_s7  ;;  %860 = vrot.lane.b32.xlu1 %v858_v26, %s1819_s7  ;;  %v1398_v32 = vmul.f32 -1.442695, %v842_v30  ;;  %v1399_v33 = vmul.f32 -1.442695, %v843_v31 }
 0xc06   :  { %1669 = vpow2.f32 %v1398_v32 }
 0xc07   :  { %1671 = vpow2.f32 %v1399_v33 }
 0xc10   :  { %v1670_v34 = vpop.eup %1669 }
 0xc11   :  { %v1672_v35 = vpop.eup %1671  ;;  %v850_v36 = vadd.f32 1.0, %v1670_v34 }
 0xc12   :  { %v851_v37 = vadd.f32 1.0, %v1672_v35 }
 0xc13   :  { %1673 = vrcp.f32 %v850_v36 }
 0xc14   :  { %1675 = vrcp.f32 %v851_v37 }
 0xc1d   :  { %v1674_v40 = vpop.eup %1673 }
 0xc1e   :  { %v1676_v41 = vpop.eup %1675  ;;  %v880_v55 = vsub.f32 1.0, %v1674_v40  ;;  %v896_v62 = vmul.f32 %v1674_v40, %v892_v58 }
 0xc1f   :  { %v881_v52 = vsub.f32 1.0, %v1676_v41  ;;  %v897_v59 = vmul.f32 %v1676_v41, %v893_v53 }
 0xc76   :  { %v863_v42 = vpop.permute.xlu0 %862  ;;  %v861_v43 = vpop.permute.xlu1 %860 }
 0xc77   :  { %v867_v44 = vmul.f32 %v1676_v41, %v863_v42  ;;  %v866_v45 = vmul.f32 %v1674_v40, %v861_v43 }
 0xc79   :  { %872 = vrot.lane.b32.xlu0 %v867_v44, %s1819_s7  ;;  %870 = vrot.lane.b32.xlu1 %v866_v45, %s1819_s7 }
 0xceb   :  { %v873_v46 = vpop.permute.xlu0 %872  ;;  %v871_v47 = vpop.permute.xlu1 %870 }
 0xcec   :  { %v877_v48 = vadd.f32 %v873_v46, %v1945_v27  ;;  %v876_v49 = vadd.f32 %v871_v47, %v1943_v25 }
 0xcee   :  { %1677 = vtanh.f32 %v877_v48 }
 0xcef   :  { %1679 = vtanh.f32 %v876_v49 }
 0xcf8   :  { %v1678_v50 = vpop.eup %1677 }
 0xcf9   :  { %v1680_v51 = vpop.eup %1679  ;;  %886 = vrot.lane.b32.xlu0 %v1678_v50, %s1820_s3 }
 0xcfa   :  { %884 = vrot.lane.b32.xlu1 %v1680_v51, %s1820_s3 }
 0xd6b   :  { %v887_v54 = vpop.permute.xlu0 %886 }
 0xd6c   :  { %v891_v60 = vmul.f32 %v887_v54, %v881_v52  ;;  %v885_v61 = vpop.permute.xlu1 %884 }
 0xd6d   :  { %v890_v63 = vmul.f32 %v885_v61, %v880_v55 }
 0xd6e   :  { %v2065_v2 = vadd.f32 %v897_v59, %v891_v60 }
 0xd6f   :  { %v2067_v3 = vadd.f32 %v896_v62, %v890_v63 }
 0xd70   :  { %v912_v4 = vrot.slane %v2065_v2, 3  ;;  %v1044_v43 = vrot.slane %v2065_v2, 7 }
 0xd71   :  { %v911_v5 = vrot.slane %v2067_v3, 4  ;;  %v1043_v46 = vrot.slane %v2067_v3, 7 }
 0xd73   :  { %v913_v6 = vsel %vm312_vm2, %v912_v4, %v911_v5 }
 0xd74   :  { %914 = vrot.lane.b32.xlu1 %v913_v6, %s1820_s3 }
 0xde6   :  { %v915_v7 = vpop.permute.xlu1 %914 }
 0xde7   :  { %1530 = vmatmul.mubr.msk.f32.vlgmr.msra.gmra.mrb[6].mxu0 %vm75_vm1, %v915_v7 }
 0xde8   :  { %1606 = vmatpush3.bf16.msra.mxu0 %v1907_v9  ;;  %1551 = vmatprep.mubr.msk.f32.mxu0 %vm1817_vm0, %v1818_v1 }
 0xde9   :  { %1607 = vmatprep.subr.bf16.mxu0 %v1816_v0 }
 0xdec   :  { %1609 = vmatpush3.bf16.msra.mxu0 %v1914_v15 }
 0xeba   :  { %v984_v8 = vpop.f32.mrb[6].mxu0 }
 0xebb   :  { %v1007_v10 = vadd.f32 %v984_v8, %v1935_v17  ;;  %v1531_v13 = vpop.f32.mrb[7].mxu0  ;;  %v989_v18 = vrot.slane %v984_v8, 3  ;;  %v990_v19 = vrot.slane %v984_v8, 4 }
 0xebd   :  { %v1010_v14 = vrot.slane %v1007_v10, 4  ;;  %v1009_v16 = vrot.slane %v1007_v10, 3  ;;  %v993_v9 = vadd.f32 %v989_v18, %v1943_v25  ;;  %v994_v1 = vadd.f32 %v990_v19, %v1945_v27 }
 0xebf   :  { %1013 = vrot.lane.b32.xlu1 %v1010_v14, %s1819_s7  ;;  %1011 = vrot.lane.b32.xlu0 %v1009_v16, %s1819_s7  ;;  %v1401_v20 = vmul.f32 -1.442695, %v993_v9  ;;  %v1402_v0 = vmul.f32 -1.442695, %v994_v1 }
 0xec1   :  { %1681 = vpow2.f32 %v1401_v20 }
 0xec2   :  { %1683 = vpow2.f32 %v1402_v0 }
 0xecb   :  { %v1682_v15 = vpop.eup %1681 }
 0xecc   :  { %v1684_v21 = vpop.eup %1683  ;;  %v1001_v22 = vadd.f32 1.0, %v1682_v15 }
 0xecd   :  { %v1002_v26 = vadd.f32 1.0, %v1684_v21 }
 0xece   :  { %1685 = vrcp.f32 %v1001_v22 }
 0xecf   :  { %1687 = vrcp.f32 %v1002_v26 }
 0xed8   :  { %v1686_v28 = vpop.eup %1685 }
 0xed9   :  { %v1688_v29 = vpop.eup %1687  ;;  %v1031_v45 = vsub.f32 1.0, %v1686_v28  ;;  %v1047_v50 = vmul.f32 %v1686_v28, %v1043_v46 }
 0xeda   :  { %v1032_v42 = vsub.f32 1.0, %v1688_v29  ;;  %v1048_v47 = vmul.f32 %v1688_v29, %v1044_v43 }
 0xf31   :  { %v1014_v30 = vpop.permute.xlu1 %1013  ;;  %v1012_v31 = vpop.permute.xlu0 %1011 }
 0xf32   :  { %v1018_v32 = vmul.f32 %v1688_v29, %v1014_v30  ;;  %v1017_v33 = vmul.f32 %v1686_v28, %v1012_v31 }
 0xf34   :  { %1023 = vrot.lane.b32.xlu1 %v1018_v32, %s1819_s7  ;;  %1021 = vrot.lane.b32.xlu0 %v1017_v33, %s1819_s7 }
 0xfa6   :  { %v1024_v34 = vpop.permute.xlu1 %1023  ;;  %v1022_v35 = vpop.permute.xlu0 %1021 }
 0xfa7   :  { %v1028_v36 = vadd.f32 %v1024_v34, %v1945_v27  ;;  %v1027_v37 = vadd.f32 %v1022_v35, %v1943_v25 }
 0xfa9   :  { %1689 = vtanh.f32 %v1028_v36 }
 0xfaa   :  { %1691 = vtanh.f32 %v1027_v37 }
 0xfb3   :  { %v1690_v40 = vpop.eup %1689 }
 0xfb4   :  { %v1692_v41 = vpop.eup %1691  ;;  %1037 = vrot.lane.b32.xlu1 %v1690_v40, %s1820_s3 }
 0xfb5   :  { %1035 = vrot.lane.b32.xlu0 %v1692_v41, %s1820_s3 }
0x1026   :  { %v1038_v44 = vpop.permute.xlu1 %1037 }
0x1027   :  { %v1042_v48 = vmul.f32 %v1038_v44, %v1032_v42  ;;  %v1036_v49 = vpop.permute.xlu0 %1035 }
0x1028   :  { %v1041_v51 = vmul.f32 %v1036_v49, %v1031_v45 }
0x1029   :  { %v2092_v52 = vadd.f32 %v1048_v47, %v1042_v48 }
0x102a   :  { %v2094_v53 = vadd.f32 %v1047_v50, %v1041_v51 }
0x102b   :  { %v1063_v54 = vrot.slane %v2092_v52, 4  ;;  %v1195_v33 = vrot.slane %v2092_v52, 7 }
0x102c   :  { %v1062_v55 = vrot.slane %v2094_v53, 5  ;;  %v1194_v36 = vrot.slane %v2094_v53, 7 }
0x102e   :  { %v1064_v58 = vsel %vm312_vm2, %v1063_v54, %v1062_v55 }
0x102f   :  { %1065 = vrot.lane.b32.xlu0 %v1064_v58, %s1820_s3 }
0x10a1   :  { %v1066_v59 = vpop.permute.xlu0 %1065 }
0x10a2   :  { %1541 = vmatmul.mubr.msk.f32.vlgmr.msra.gmra.mrb[6].mxu1 %vm75_vm1, %v1066_v59 }
0x1175   :  { %v1135_v60 = vpop.f32.mrb[6].mxu1 }
0x1176   :  { %v1158_v61 = vadd.f32 %v1135_v60, %v1935_v17  ;;  %v1542_v62 = vpop.f32.mrb[7].mxu1  ;;  %v1140_v5 = vrot.slane %v1135_v60, 2  ;;  %v1141_v6 = vrot.slane %v1135_v60, 3 }
0x1178   :  { %v1161_v63 = vrot.slane %v1158_v61, 3  ;;  %v1160_v4 = vrot.slane %v1158_v61, 2  ;;  %v1144_v7 = vadd.f32 %v1140_v5, %v1943_v25  ;;  %v1145_v8 = vadd.f32 %v1141_v6, %v1945_v27 }
0x117a   :  { %1164 = vrot.lane.b32.xlu0 %v1161_v63, %s1819_s7  ;;  %1162 = vrot.lane.b32.xlu1 %v1160_v4, %s1819_s7  ;;  %v1404_v10 = vmul.f32 -1.442695, %v1144_v7  ;;  %v1405_v13 = vmul.f32 -1.442695, %v1145_v8 }
0x117c   :  { %1693 = vpow2.f32 %v1404_v10 }
0x117d   :  { %1695 = vpow2.f32 %v1405_v13 }
0x1186   :  { %v1694_v14 = vpop.eup %1693 }
0x1187   :  { %v1696_v16 = vpop.eup %1695  ;;  %v1152_v18 = vadd.f32 1.0, %v1694_v14 }
0x1188   :  { %v1153_v19 = vadd.f32 1.0, %v1696_v16 }
0x1189   :  { %1697 = vrcp.f32 %v1152_v18 }
0x118a   :  { %1699 = vrcp.f32 %v1153_v19 }
0x1193   :  { %v1698_v9 = vpop.eup %1697 }
0x1194   :  { %v1700_v1 = vpop.eup %1699  ;;  %v1182_v35 = vsub.f32 1.0, %v1698_v9  ;;  %v1198_v42 = vmul.f32 %v1698_v9, %v1194_v36 }
0x1195   :  { %v1183_v32 = vsub.f32 1.0, %v1700_v1  ;;  %v1199_v37 = vmul.f32 %v1700_v1, %v1195_v33 }
0x11ec   :  { %v1165_v20 = vpop.permute.xlu0 %1164  ;;  %v1163_v0 = vpop.permute.xlu1 %1162 }
0x11ed   :  { %v1169_v15 = vmul.f32 %v1700_v1, %v1165_v20  ;;  %v1168_v21 = vmul.f32 %v1698_v9, %v1163_v0 }
0x11ef   :  { %1174 = vrot.lane.b32.xlu0 %v1169_v15, %s1819_s7  ;;  %1172 = vrot.lane.b32.xlu1 %v1168_v21, %s1819_s7 }
0x1261   :  { %v1175_v22 = vpop.permute.xlu0 %1174  ;;  %v1173_v26 = vpop.permute.xlu1 %1172 }
0x1262   :  { %v1179_v28 = vadd.f32 %v1175_v22, %v1945_v27  ;;  %v1178_v29 = vadd.f32 %v1173_v26, %v1943_v25 }
0x1264   :  { %1701 = vtanh.f32 %v1179_v28 }
0x1265   :  { %1703 = vtanh.f32 %v1178_v29 }
0x126e   :  { %v1702_v30 = vpop.eup %1701 }
0x126f   :  { %v1704_v31 = vpop.eup %1703  ;;  %1188 = vrot.lane.b32.xlu0 %v1702_v30, %s1820_s3 }
0x1270   :  { %1186 = vrot.lane.b32.xlu1 %v1704_v31, %s1820_s3 }
0x12e1   :  { %v1189_v34 = vpop.permute.xlu0 %1188 }
0x12e2   :  { %v1193_v40 = vmul.f32 %v1189_v34, %v1183_v32  ;;  %v1187_v41 = vpop.permute.xlu1 %1186 }
0x12e3   :  { %v1192_v43 = vmul.f32 %v1187_v41, %v1182_v35 }
0x12e4   :  { %v2114_v44 = vadd.f32 %v1199_v37, %v1193_v40 }
0x12e5   :  { %v2116_v45 = vadd.f32 %v1198_v42, %v1192_v43 }
0x12e6   :  { %v1214_v46 = vrot.slane %v2114_v44, 5 }
0x12e7   :  { %v1213_v47 = vrot.slane %v2116_v45, 6 }
0x12e9   :  { %v1215_v48 = vsel %vm312_vm2, %v1214_v46, %v1213_v47 }
0x12ea   :  { %1216 = vrot.lane.b32.xlu1 %v1215_v48, %s1820_s3 }
0x135c   :  { %v1217_v49 = vpop.permute.xlu1 %1216 }
0x135d   :  { %1552 = vmatmul.mubr.msk.f32.vlgmr.msra.gmra.mrb[8].mxu0 %vm75_vm1, %v1217_v49 }
0x1430   :  { %v1286_v50 = vpop.f32.mrb[8].mxu0 }
0x1431   :  { %v1309_v51 = vadd.f32 %v1286_v50, %v1935_v17  ;;  %v1553_v54 = vpop.f32.mrb[9].mxu0  ;;  %v1291_v59 = vrot.slane %v1286_v50, 1  ;;  %v1292_v60 = vrot.slane %v1286_v50, 2 }
0x1433   :  { %v1312_v55 = vrot.slane %v1309_v51, 2  ;;  %v1311_v58 = vrot.slane %v1309_v51, 1  ;;  %v1295_v61 = vadd.f32 %v1291_v59, %v1943_v25  ;;  %v1296_v62 = vadd.f32 %v1292_v60, %v1945_v27 }
0x1435   :  { %1315 = vrot.lane.b32.xlu1 %v1312_v55, %s1819_s7  ;;  %1313 = vrot.lane.b32.xlu0 %v1311_v58, %s1819_s7  ;;  %v1407_v63 = vmul.f32 -1.442695, %v1295_v61  ;;  %v1408_v4 = vmul.f32 -1.442695, %v1296_v62 }
0x1437   :  { %1705 = vpow2.f32 %v1407_v63 }
0x1438   :  { %1707 = vpow2.f32 %v1408_v4 }
0x1441   :  { %v1706_v5 = vpop.eup %1705 }
0x1442   :  { %v1708_v6 = vpop.eup %1707  ;;  %v1303_v17 = vadd.f32 1.0, %v1706_v5 }
0x1443   :  { %v1304_v7 = vadd.f32 1.0, %v1708_v6 }
0x1444   :  { %1709 = vrcp.f32 %v1303_v17 }
0x1445   :  { %1711 = vrcp.f32 %v1304_v7 }
0x144e   :  { %v1710_v8 = vpop.eup %1709 }
0x144f   :  { %v1712_v10 = vpop.eup %1711 }
0x14a7   :  { %v1316_v13 = vpop.permute.xlu1 %1315  ;;  %v1314_v14 = vpop.permute.xlu0 %1313 }
0x14a8   :  { %v1320_v16 = vmul.f32 %v1712_v10, %v1316_v13  ;;  %v1319_v18 = vmul.f32 %v1710_v8, %v1314_v14 }
0x14aa   :  { %1325 = vrot.lane.b32.xlu1 %v1320_v16, %s1819_s7  ;;  %1323 = vrot.lane.b32.xlu0 %v1319_v18, %s1819_s7 }
0x151c   :  { %v1326_v19 = vpop.permute.xlu1 %1325  ;;  %v1324_v9 = vpop.permute.xlu0 %1323 }
0x151d   :  { %v1330_v1 = vadd.f32 %v1326_v19, %v1945_v27  ;;  %v1329_v20 = vadd.f32 %v1324_v9, %v1943_v25  ;;  %v1334_v25 = vsub.f32 1.0, %v1712_v10  ;;  %v1346_v27 = vrot.slane %v2114_v44, 7 }
0x151f   :  { %1713 = vtanh.f32 %v1330_v1 }
0x1520   :  { %1715 = vtanh.f32 %v1329_v20 }
0x1529   :  { %v1714_v0 = vpop.eup %1713 }
0x152a   :  { %v1716_v15 = vpop.eup %1715  ;;  %1339 = vrot.lane.b32.xlu1 %v1714_v0, %s1820_s3 }
0x152b   :  { %1337 = vrot.lane.b32.xlu0 %v1716_v15, %s1820_s3 }
0x152e   :  { %304 = vrot.lane.b32.xlu1 %v1955_v56, %s1820_s3 }
0x152f   :  { %302 = vrot.lane.b32.xlu0 %v1957_v57, %s1820_s3  ;;  %v1333_v57 = vsub.f32 1.0, %v1710_v8 }
0x1532   :  { %452 = vrot.lane.b32.xlu1 %v1984_v39, %s1820_s3  ;;  %v1350_v39 = vmul.f32 %v1712_v10, %v1346_v27 }
0x1533   :  { %450 = vrot.lane.b32.xlu0 %v1982_v38, %s1820_s3  ;;  %v1345_v38 = vrot.slane %v2116_v45, 7 }
0x1536   :  { %602 = vrot.lane.b32.xlu1 %v2010_v23, %s1820_s3 }
0x1537   :  { %600 = vrot.lane.b32.xlu0 %v2012_v24, %s1820_s3 }
0x153a   :  { %753 = vrot.lane.b32.xlu1 %v2038_v11, %s1820_s3  ;;  %v1349_v11 = vmul.f32 %v1710_v8, %v1345_v38 }
0x153b   :  { %751 = vrot.lane.b32.xlu0 %v2040_v12, %s1820_s3 }
0x153e   :  { %904 = vrot.lane.b32.xlu1 %v2065_v2, %s1820_s3 }
0x153f   :  { %902 = vrot.lane.b32.xlu0 %v2067_v3, %s1820_s3 }
0x1542   :  { %1055 = vrot.lane.b32.xlu1 %v2092_v52, %s1820_s3 }
0x1543   :  { %1053 = vrot.lane.b32.xlu0 %v2094_v53, %s1820_s3 }
0x1546   :  { %1206 = vrot.lane.b32.xlu1 %v2114_v44, %s1820_s3 }
0x1547   :  { %1204 = vrot.lane.b32.xlu0 %v2116_v45, %s1820_s3 }
0x159c   :  { %v1340_v56 = vpop.permute.xlu1 %1339 }
0x159d   :  { %v1344_v23 = vmul.f32 %v1340_v56, %v1334_v25  ;;  %v1338_v24 = vpop.permute.xlu0 %1337 }
0x159e   :  { %v1343_v12 = vmul.f32 %v1338_v24, %v1333_v57 }
0x159f   :  { %v1352_v2 = vadd.f32 %v1350_v39, %v1344_v23 }
0x15a0   :  { %v1351_v3 = vadd.f32 %v1349_v11, %v1343_v12  ;;  %v305_v52 = vpop.permute.xlu1 %304 }
0x15a1   :  { %310 = vst.msk [vmem:[#allocation8 + $0x8] sm:$0x1] %vm308_vm3, %v305_v52  ;;  %v303_v53 = vpop.permute.xlu0 %302  ;;  %1357 = vrot.lane.b32.xlu1 %v1352_v2, %s1820_s3 }
0x15a2   :  { %309 = vst.msk [vmem:[#allocation8] sm:$0x1] %vm308_vm3, %v303_v53  ;;  %1355 = vrot.lane.b32.xlu0 %v1351_v3, %s1820_s3 }
0x15a4   :  { %v453_v21 = vpop.permute.xlu1 %452 }
0x15a5   :  { %458 = vst.msk [vmem:[#allocation8 + $0x8] sm:$0x2] %vm456_vm4, %v453_v21  ;;  %v451_v22 = vpop.permute.xlu0 %450 }
0x15a6   :  { %457 = vst.msk [vmem:[#allocation8] sm:$0x2] %vm456_vm4, %v451_v22 }
0x15a8   :  { %v603_v26 = vpop.permute.xlu1 %602 }
0x15a9   :  { %608 = vst.msk [vmem:[#allocation8 + $0x8] sm:$0x4] %vm606_vm5, %v603_v26  ;;  %v601_v28 = vpop.permute.xlu0 %600 }
0x15aa   :  { %607 = vst.msk [vmem:[#allocation8] sm:$0x4] %vm606_vm5, %v601_v28 }
0x15ac   :  { %v754_v29 = vpop.permute.xlu1 %753 }
0x15ad   :  { %759 = vst.msk [vmem:[#allocation8 + $0x8] sm:$0x8] %vm757_vm6, %v754_v29  ;;  %v752_v30 = vpop.permute.xlu0 %751 }
0x15ae   :  { %758 = vst.msk [vmem:[#allocation8] sm:$0x8] %vm757_vm6, %v752_v30 }
0x15b0   :  { %v905_v31 = vpop.permute.xlu1 %904 }
0x15b1   :  { %910 = vst.msk [vmem:[#allocation8 + $0x8] sm:$0x10] %vm908_vm7, %v905_v31  ;;  %v903_v32 = vpop.permute.xlu0 %902 }
0x15b2   :  { %909 = vst.msk [vmem:[#allocation8] sm:$0x10] %vm908_vm7, %v903_v32 }
0x15b4   :  { %v1056_v33 = vpop.permute.xlu1 %1055 }
0x15b5   :  { %1061 = vst.msk [vmem:[#allocation8 + $0x8] sm:$0x20] %vm1059_vm8, %v1056_v33  ;;  %v1054_v34 = vpop.permute.xlu0 %1053 }
0x15b6   :  { %1060 = vst.msk [vmem:[#allocation8] sm:$0x20] %vm1059_vm8, %v1054_v34 }
0x15b8   :  { %v1207_v35 = vpop.permute.xlu1 %1206 }
0x15b9   :  { %1212 = vst.msk [vmem:[#allocation8 + $0x8] sm:$0x40] %vm1210_vm9, %v1207_v35  ;;  %v1205_v36 = vpop.permute.xlu0 %1204 }
0x15ba   :  { %1211 = vst.msk [vmem:[#allocation8] sm:$0x40] %vm1210_vm9, %v1205_v36 }
0x1613   :  { %v1358_v37 = vpop.permute.xlu1 %1357 }
0x1614   :  { %1363 = vst.msk [vmem:[#allocation8 + $0x8] sm:$0x80] %vm1361_vm10, %v1358_v37  ;;  %v1356_v40 = vpop.permute.xlu0 %1355 }
0x1615   :  { %1362 = vst.msk [vmem:[#allocation8] sm:$0x80] %vm1361_vm10, %v1356_v40 }
0x1616   :  { %1794 = shalt.err (!%p1791_p0)
}
0x1617   :  { %s1795_s14 = scalar_lea.hbm %s2186_s5, 256 }
0x1618   :  { %p1796_p1 = scmp.ne.s32.totalorder %s2186_s5, %s1795_s14  ;;  %p1799_p2 = scmp.lt.u32.totalorder %s1795_s14, %s2186_s5 }
0x161a   :  { %p1801_p3 = pnand %p1799_p2, %p1796_p1 }
0x161c   :  { %1804 = shalt.err (!%p1801_p3)
}
0x161d   :  { %1375 = dma.vmem_to_hbm [thread:$0]  %s1370_s10, 256, %s2186_s5, [#allocation4], %s1813_s30, %s1813_s30, %s1814_s6  }
0x161e   :  { %1809 = dma.done.wait [#allocation4], 256  }
0x161f   :  { %1810 = vsyncadd [#allocation4], 4294967040 }
0x1620   :  { %1379 = vsyncpa [#allocation3], 1 }
0x1621   :  { %1380 = vsyncpa [#allocation6], 1 }
0x1622   :  { %1381 = vsyncpa [#allocation4], 1 }

</bundles_post_ra>
